<compile_context>
chip_gen: v7x
topology: tpu7x:2x2x1
jax: 0.10.0
libtpu: 0.0.40
codegen_flags: <defaults>
</compile_context>

<pallas_src>
import math

import jax
import jax.numpy as jnp
import numpy as np
from jax.experimental import pallas as pl
from jax.experimental.pallas import tpu as pltpu

# --- small, module-consistent sizes -----------------------------------------
EMB_SIZE = 32            # per-coordinate sinusoidal embedding width
HIDDEN = 32              # hidden_size
HIDDEN_LAYERS = 3        # number of residual Blocks
INPUT_DIM = 2            # input_dim
SCALE = 25.0             # PositionalEmbedding scale
HALF = EMB_SIZE // 2
CONCAT = 2 * EMB_SIZE    # concat_size
TB_MAX = 2048            # max batch tile (raised from 512 per perf review)
LANE_ALIGN = 256         # v6e/v7x MXU lane width; also a multiple of v5e's 128

APPROX_GELU = True
# TODO(synk): torch.nn.GELU() is the exact erf form; tanh-GELU diverges by
#             ~1e-3 relative.  Set APPROX_GELU = False for closer parity with
#             the torch module (at the cost of a long VALU erf polynomial).


def _gelu(x):
    return jax.nn.gelu(x, approximate=APPROX_GELU)


def mlp_kernel(x_ref, freqs_ref, w0_ref, b0_ref, wb_ref, bb_ref, wo_ref, bo_ref,
               o_ref):
    # Feature-major layout: features on sublanes, batch on the 128-wide lanes.
    f = freqs_ref[...]                           # (HALF, 1), SCALE pre-folded
    e1 = f * x_ref[0:1, :]                       # (HALF, TB)
    e2 = f * x_ref[1:2, :]                       # (HALF, TB)

    # Embedding concat folded along the sublane axis, then one K=64 MXU dot.
    emb = jnp.concatenate(
        [jnp.sin(e1), jnp.cos(e1), jnp.sin(e2), jnp.cos(e2)], axis=0)  # (CONCAT, TB)
    h = _gelu(jnp.dot(w0_ref[...], emb, preferred_element_type=jnp.float32)
              + b0_ref[...])                     # (HIDDEN, TB)

    # 3 residual Blocks: h + GELU(W h + b)
    for l in range(HIDDEN_LAYERS):
        h = h + _gelu(jnp.dot(wb_ref[l], h, preferred_element_type=jnp.float32)
                      + bb_ref[l])

    # final Linear(HIDDEN, INPUT_DIM) -> lane-dense (INPUT_DIM, TB) store.
    o_ref[...] = (jnp.dot(wo_ref[...], h, preferred_element_type=jnp.float32)
                  + bo_ref[...])


def _round_up(a, b):
    return (a + b - 1) // b * b


def _choose_tile(n):
    """Adaptive batch tile: up to TB_MAX for big batches, lane-aligned minimum
    for small ones, and at least 2 grid steps when the batch permits (so both
    v7x TensorCores get a share of the "parallel" grid axis)."""
    n_aligned = _round_up(max(n, 1), LANE_ALIGN)
    tb = min(TB_MAX, n_aligned)
    if n_aligned >= 2 * LANE_ALIGN:
        tb = min(tb, _round_up(pl.cdiv(n_aligned, 2), LANE_ALIGN))
    return tb


def mlp_forward(x, t, params):
    """Mirrors MLP.forward(x, t). `t` is accepted but unused (as in the module)."""
    del t
    freqs, w0, b0, wb, bb, wo, bo = params       # PyTorch (out, in) weight layout
    N = x.shape[0]

    tb = _choose_tile(N)
    n_pad = tb * pl.cdiv(N, tb)
    grid = (n_pad // tb,)

    # ---- host-side packing (cheap XLA ops, outside the kernel) ----
    # Only the ragged tail is padded; aligned batches avoid any extra full copy.
    x_t = x.astype(jnp.float32).T                                  # (INPUT_DIM, N)
    if n_pad != N:
        x_t = jnp.pad(x_t, ((0, 0), (0, n_pad - N)))
    freqs_col = (freqs * SCALE).reshape(HALF, 1).astype(jnp.float32)
    b0c = b0.reshape(HIDDEN, 1)
    bbc = bb.reshape(HIDDEN_LAYERS, HIDDEN, 1)
    boc = bo.reshape(INPUT_DIM, 1)

    flops = 2 * n_pad * (CONCAT * HIDDEN
                         + HIDDEN_LAYERS * HIDDEN * HIDDEN
                         + HIDDEN * INPUT_DIM)
    transcendentals = n_pad * (2 * EMB_SIZE + (1 + HIDDEN_LAYERS) * HIDDEN)
    weight_bytes = 4 * (HALF + CONCAT * HIDDEN + HIDDEN
                        + HIDDEN_LAYERS * (HIDDEN * HIDDEN + HIDDEN)
                        + HIDDEN * INPUT_DIM + INPUT_DIM)
    cost = pl.CostEstimate(flops=flops,
                           transcendentals=transcendentals,
                           bytes_accessed=4 * n_pad * 2 * INPUT_DIM + weight_bytes)

    out_t = pl.pallas_call(
        mlp_kernel,
        out_shape=jax.ShapeDtypeStruct((INPUT_DIM, n_pad), jnp.float32),
        grid_spec=pltpu.PrefetchScalarGridSpec(
            num_scalar_prefetch=0,
            grid=grid,
            in_specs=[
                pl.BlockSpec((INPUT_DIM, tb), lambda i: (0, i)),                 # x (2, tb)
                pl.BlockSpec((HALF, 1), lambda i: (0, 0)),                       # freqs
                pl.BlockSpec((HIDDEN, CONCAT), lambda i: (0, 0)),                # w0
                pl.BlockSpec((HIDDEN, 1), lambda i: (0, 0)),                     # b0
                pl.BlockSpec((HIDDEN_LAYERS, HIDDEN, HIDDEN), lambda i: (0, 0, 0)),  # block W
                pl.BlockSpec((HIDDEN_LAYERS, HIDDEN, 1), lambda i: (0, 0, 0)),   # block b
                pl.BlockSpec((INPUT_DIM, HIDDEN), lambda i: (0, 0)),             # wo
                pl.BlockSpec((INPUT_DIM, 1), lambda i: (0, 0)),                  # bo
            ],
            out_specs=pl.BlockSpec((INPUT_DIM, tb), lambda i: (0, i)),
        ),
        compiler_params=pltpu.CompilerParams(
            dimension_semantics=("parallel",)),
        cost_estimate=cost,
    )(x_t, freqs_col, w0, b0c, wb, bbc, wo, boc)

    return out_t.T[:N]                                              # (N, INPUT_DIM)


def init_params(key):
    """Deterministic PyTorch-Linear-style init; weights kept in torch (out, in) layout."""
    def linear(key, fan_in, fan_out):
        kw, kb = jax.random.split(key)
        bound = 1.0 / np.sqrt(fan_in)
        w = jax.random.uniform(kw, (fan_out, fan_in), jnp.float32, -bound, bound)
        b = jax.random.uniform(kb, (fan_out,), jnp.float32, -bound, bound)
        return w, b

    keys = jax.random.split(key, 2 + HIDDEN_LAYERS)
    emb_coeff = math.log(10000.0) / (HALF - 1)
    freqs = jnp.exp(-emb_coeff * jnp.arange(HALF, dtype=jnp.float32))   # (HALF,)

    w0, b0 = linear(keys[0], CONCAT, HIDDEN)
    wb_list, bb_list = [], []
    for l in range(HIDDEN_LAYERS):
        w, b = linear(keys[1 + l], HIDDEN, HIDDEN)
        wb_list.append(w)
        bb_list.append(b)
    wb = jnp.stack(wb_list, axis=0)        # (L, H, H)
    bb = jnp.stack(bb_list, axis=0)        # (L, H)
    wo, bo = linear(keys[-1], HIDDEN, INPUT_DIM)
    return (freqs, w0, b0, wb, bb, wo, bo)


def mlp_reference(x, params):
    """Pure-JAX reference (same math, batch-major) for the correctness check."""
    freqs, w0, b0, wb, bb, wo, bo = params
    xs = x * SCALE
    e1 = xs[:, 0:1] * freqs[None, :]
    e2 = xs[:, 1:2] * freqs[None, :]
    emb = jnp.concatenate([jnp.sin(e1), jnp.cos(e1), jnp.sin(e2), jnp.cos(e2)], -1)
    h = _gelu(emb @ w0.T + b0)
    for l in range(HIDDEN_LAYERS):
        h = h + _gelu(h @ wb[l].T + bb[l])
    return h @ wo.T + bo


if __name__ == "__main__":
    key = jax.random.PRNGKey(0)
    kx, kp, kt = jax.random.split(key, 3)
    params = init_params(kp)

    # N=200 exercises the ragged-tail padding path (single grid step);
    # N=1000 exercises the multi-step grid (>=2 steps for the v7x 2-TC split).
    for N in (200, 1000):
        x = jax.random.normal(jax.random.fold_in(kx, N), (N, INPUT_DIM), jnp.float32)
        t = jax.random.randint(kt, (N,), 0, 50)   # unused by forward, signature parity
        out = mlp_forward(x, t, params)
        out = jax.block_until_ready(out)
        ref = mlp_reference(x, params)
        assert out.shape == (N, INPUT_DIM)
        np.testing.assert_allclose(np.asarray(out), np.asarray(ref),
                                   rtol=1e-4, atol=1e-4)

    print("KERNEL_OK")
</pallas_src>

<mosaic_0001>
module attributes {stable_mosaic.version = 11 : i64} {
  func.func @mlp_kernel(%arg0: i32, %arg1: memref<2x256xf32, #tpu.memory_space<vmem>>, %arg2: memref<16x1xf32, #tpu.memory_space<vmem>>, %arg3: memref<32x64xf32, #tpu.memory_space<vmem>>, %arg4: memref<32x1xf32, #tpu.memory_space<vmem>>, %arg5: memref<3x32x32xf32, #tpu.memory_space<vmem>>, %arg6: memref<3x32x1xf32, #tpu.memory_space<vmem>>, %arg7: memref<2x32xf32, #tpu.memory_space<vmem>>, %arg8: memref<2x1xf32, #tpu.memory_space<vmem>>, %arg9: memref<2x256xf32, #tpu.memory_space<vmem>>) attributes {dimension_semantics = [#tpu.dimension_semantics<parallel>], iteration_bounds = array<i64: 1>, scalar_prefetch = 0 : i64, scratch_operands = 0 : i64, tpu.core_type = #tpu.core_type<tc>, window_params = [{transform_indices = @transform_0, window_bounds = array<i64: 2, 256>}, {pipeline_mode = #tpu.pipeline_mode<synchronous>, transform_indices = @transform_1, window_bounds = array<i64: 16, 1>}, {pipeline_mode = #tpu.pipeline_mode<synchronous>, transform_indices = @transform_2, window_bounds = array<i64: 32, 64>}, {pipeline_mode = #tpu.pipeline_mode<synchronous>, transform_indices = @transform_3, window_bounds = array<i64: 32, 1>}, {pipeline_mode = #tpu.pipeline_mode<synchronous>, transform_indices = @transform_4, window_bounds = array<i64: 3, 32, 32>}, {pipeline_mode = #tpu.pipeline_mode<synchronous>, transform_indices = @transform_5, window_bounds = array<i64: 3, 32, 1>}, {pipeline_mode = #tpu.pipeline_mode<synchronous>, transform_indices = @transform_6, window_bounds = array<i64: 2, 32>}, {pipeline_mode = #tpu.pipeline_mode<synchronous>, transform_indices = @transform_7, window_bounds = array<i64: 2, 1>}, {transform_indices = @transform_8, window_bounds = array<i64: 2, 256>}]} {
    %c0 = arith.constant 0 : index
    %c0_0 = arith.constant 0 : index
    %0 = vector.load %arg2[%c0, %c0_0] : memref<16x1xf32, #tpu.memory_space<vmem>>, vector<16x1xf32>
    %c0_1 = arith.constant 0 : index
    %c0_2 = arith.constant 0 : index
    %1 = vector.load %arg1[%c0_1, %c0_2] : memref<2x256xf32, #tpu.memory_space<vmem>>, vector<1x256xf32>
    %2 = vector.broadcast %0 : vector<16x1xf32> to vector<16x256xf32>
    %3 = vector.broadcast %1 : vector<1x256xf32> to vector<16x256xf32>
    %4 = arith.mulf %2, %3 : vector<16x256xf32>
    %c1 = arith.constant 1 : index
    %c0_3 = arith.constant 0 : index
    %5 = vector.load %arg1[%c1, %c0_3] : memref<2x256xf32, #tpu.memory_space<vmem>>, vector<1x256xf32>
    %6 = vector.broadcast %0 : vector<16x1xf32> to vector<16x256xf32>
    %7 = vector.broadcast %5 : vector<1x256xf32> to vector<16x256xf32>
    %8 = arith.mulf %6, %7 : vector<16x256xf32>
    %9 = math.sin %4 : vector<16x256xf32>
    %10 = math.cos %4 : vector<16x256xf32>
    %11 = math.sin %8 : vector<16x256xf32>
    %12 = math.cos %8 : vector<16x256xf32>
    %13 = tpu.concatenate %9, %10, %11, %12 in 0 : vector<16x256xf32>, vector<16x256xf32>, vector<16x256xf32>, vector<16x256xf32> -> vector<64x256xf32>
    %c0_4 = arith.constant 0 : index
    %c0_5 = arith.constant 0 : index
    %14 = vector.load %arg3[%c0_4, %c0_5] : memref<32x64xf32, #tpu.memory_space<vmem>>, vector<32x64xf32>
    %cst = arith.constant dense<0.000000e+00> : vector<32x256xf32>
    %15 = tpu.matmul %14, %13, %cst {dimension_numbers = #tpu.dot_dimension_numbers<[1], [0], [0], [1], [0, 0, 1, 1], [], []>} : vector<32x64xf32>, vector<64x256xf32>, vector<32x256xf32> -> vector<32x256xf32>
    %c0_6 = arith.constant 0 : index
    %c0_7 = arith.constant 0 : index
    %16 = vector.load %arg4[%c0_6, %c0_7] : memref<32x1xf32, #tpu.memory_space<vmem>>, vector<32x1xf32>
    %17 = vector.broadcast %16 : vector<32x1xf32> to vector<32x256xf32>
    %18 = arith.addf %15, %17 : vector<32x256xf32>
    %19 = arith.mulf %18, %18 : vector<32x256xf32>
    %20 = arith.mulf %18, %19 : vector<32x256xf32>
    %cst_8 = arith.constant 4.471500e-02 : f32
    %21 = vector.broadcast %cst_8 : f32 to vector<32x256xf32>
    %22 = arith.mulf %21, %20 : vector<32x256xf32>
    %23 = arith.addf %18, %22 : vector<32x256xf32>
    %cst_9 = arith.constant 0.797884583 : f32
    %24 = vector.broadcast %cst_9 : f32 to vector<32x256xf32>
    %25 = arith.mulf %24, %23 : vector<32x256xf32>
    %26 = math.tanh %25 : vector<32x256xf32>
    %cst_10 = arith.constant 1.000000e+00 : f32
    %27 = vector.broadcast %cst_10 : f32 to vector<32x256xf32>
    %28 = arith.addf %27, %26 : vector<32x256xf32>
    %cst_11 = arith.constant 5.000000e-01 : f32
    %29 = vector.broadcast %cst_11 : f32 to vector<32x256xf32>
    %30 = arith.mulf %29, %28 : vector<32x256xf32>
    %31 = arith.mulf %18, %30 : vector<32x256xf32>
    %c0_12 = arith.constant 0 : index
    %c0_13 = arith.constant 0 : index
    %c0_14 = arith.constant 0 : index
    %32 = vector.load %arg5[%c0_12, %c0_13, %c0_14] : memref<3x32x32xf32, #tpu.memory_space<vmem>>, vector<1x32x32xf32>
    %33 = vector.shape_cast %32 : vector<1x32x32xf32> to vector<32x32xf32>
    %cst_15 = arith.constant dense<0.000000e+00> : vector<32x256xf32>
    %34 = tpu.matmul %33, %31, %cst_15 {dimension_numbers = #tpu.dot_dimension_numbers<[1], [0], [0], [1], [0, 0, 1, 1], [], []>} : vector<32x32xf32>, vector<32x256xf32>, vector<32x256xf32> -> vector<32x256xf32>
    %c0_16 = arith.constant 0 : index
    %c0_17 = arith.constant 0 : index
    %c0_18 = arith.constant 0 : index
    %35 = vector.load %arg6[%c0_16, %c0_17, %c0_18] : memref<3x32x1xf32, #tpu.memory_space<vmem>>, vector<1x32x1xf32>
    %36 = vector.shape_cast %35 : vector<1x32x1xf32> to vector<32x1xf32>
    %37 = vector.broadcast %36 : vector<32x1xf32> to vector<32x256xf32>
    %38 = arith.addf %34, %37 : vector<32x256xf32>
    %39 = arith.mulf %38, %38 : vector<32x256xf32>
    %40 = arith.mulf %38, %39 : vector<32x256xf32>
    %cst_19 = arith.constant 4.471500e-02 : f32
    %41 = vector.broadcast %cst_19 : f32 to vector<32x256xf32>
    %42 = arith.mulf %41, %40 : vector<32x256xf32>
    %43 = arith.addf %38, %42 : vector<32x256xf32>
    %cst_20 = arith.constant 0.797884583 : f32
    %44 = vector.broadcast %cst_20 : f32 to vector<32x256xf32>
    %45 = arith.mulf %44, %43 : vector<32x256xf32>
    %46 = math.tanh %45 : vector<32x256xf32>
    %cst_21 = arith.constant 1.000000e+00 : f32
    %47 = vector.broadcast %cst_21 : f32 to vector<32x256xf32>
    %48 = arith.addf %47, %46 : vector<32x256xf32>
    %cst_22 = arith.constant 5.000000e-01 : f32
    %49 = vector.broadcast %cst_22 : f32 to vector<32x256xf32>
    %50 = arith.mulf %49, %48 : vector<32x256xf32>
    %51 = arith.mulf %38, %50 : vector<32x256xf32>
    %52 = arith.addf %31, %51 : vector<32x256xf32>
    %c1_23 = arith.constant 1 : index
    %c0_24 = arith.constant 0 : index
    %c0_25 = arith.constant 0 : index
    %53 = vector.load %arg5[%c1_23, %c0_24, %c0_25] : memref<3x32x32xf32, #tpu.memory_space<vmem>>, vector<1x32x32xf32>
    %54 = vector.shape_cast %53 : vector<1x32x32xf32> to vector<32x32xf32>
    %cst_26 = arith.constant dense<0.000000e+00> : vector<32x256xf32>
    %55 = tpu.matmul %54, %52, %cst_26 {dimension_numbers = #tpu.dot_dimension_numbers<[1], [0], [0], [1], [0, 0, 1, 1], [], []>} : vector<32x32xf32>, vector<32x256xf32>, vector<32x256xf32> -> vector<32x256xf32>
    %c1_27 = arith.constant 1 : index
    %c0_28 = arith.constant 0 : index
    %c0_29 = arith.constant 0 : index
    %56 = vector.load %arg6[%c1_27, %c0_28, %c0_29] : memref<3x32x1xf32, #tpu.memory_space<vmem>>, vector<1x32x1xf32>
    %57 = vector.shape_cast %56 : vector<1x32x1xf32> to vector<32x1xf32>
    %58 = vector.broadcast %57 : vector<32x1xf32> to vector<32x256xf32>
    %59 = arith.addf %55, %58 : vector<32x256xf32>
    %60 = arith.mulf %59, %59 : vector<32x256xf32>
    %61 = arith.mulf %59, %60 : vector<32x256xf32>
    %cst_30 = arith.constant 4.471500e-02 : f32
    %62 = vector.broadcast %cst_30 : f32 to vector<32x256xf32>
    %63 = arith.mulf %62, %61 : vector<32x256xf32>
    %64 = arith.addf %59, %63 : vector<32x256xf32>
    %cst_31 = arith.constant 0.797884583 : f32
    %65 = vector.broadcast %cst_31 : f32 to vector<32x256xf32>
    %66 = arith.mulf %65, %64 : vector<32x256xf32>
    %67 = math.tanh %66 : vector<32x256xf32>
    %cst_32 = arith.constant 1.000000e+00 : f32
    %68 = vector.broadcast %cst_32 : f32 to vector<32x256xf32>
    %69 = arith.addf %68, %67 : vector<32x256xf32>
    %cst_33 = arith.constant 5.000000e-01 : f32
    %70 = vector.broadcast %cst_33 : f32 to vector<32x256xf32>
    %71 = arith.mulf %70, %69 : vector<32x256xf32>
    %72 = arith.mulf %59, %71 : vector<32x256xf32>
    %73 = arith.addf %52, %72 : vector<32x256xf32>
    %c2 = arith.constant 2 : index
    %c0_34 = arith.constant 0 : index
    %c0_35 = arith.constant 0 : index
    %74 = vector.load %arg5[%c2, %c0_34, %c0_35] : memref<3x32x32xf32, #tpu.memory_space<vmem>>, vector<1x32x32xf32>
    %75 = vector.shape_cast %74 : vector<1x32x32xf32> to vector<32x32xf32>
    %cst_36 = arith.constant dense<0.000000e+00> : vector<32x256xf32>
    %76 = tpu.matmul %75, %73, %cst_36 {dimension_numbers = #tpu.dot_dimension_numbers<[1], [0], [0], [1], [0, 0, 1, 1], [], []>} : vector<32x32xf32>, vector<32x256xf32>, vector<32x256xf32> -> vector<32x256xf32>
    %c2_37 = arith.constant 2 : index
    %c0_38 = arith.constant 0 : index
    %c0_39 = arith.constant 0 : index
    %77 = vector.load %arg6[%c2_37, %c0_38, %c0_39] : memref<3x32x1xf32, #tpu.memory_space<vmem>>, vector<1x32x1xf32>
    %78 = vector.shape_cast %77 : vector<1x32x1xf32> to vector<32x1xf32>
    %79 = vector.broadcast %78 : vector<32x1xf32> to vector<32x256xf32>
    %80 = arith.addf %76, %79 : vector<32x256xf32>
    %81 = arith.mulf %80, %80 : vector<32x256xf32>
    %82 = arith.mulf %80, %81 : vector<32x256xf32>
    %cst_40 = arith.constant 4.471500e-02 : f32
    %83 = vector.broadcast %cst_40 : f32 to vector<32x256xf32>
    %84 = arith.mulf %83, %82 : vector<32x256xf32>
    %85 = arith.addf %80, %84 : vector<32x256xf32>
    %cst_41 = arith.constant 0.797884583 : f32
    %86 = vector.broadcast %cst_41 : f32 to vector<32x256xf32>
    %87 = arith.mulf %86, %85 : vector<32x256xf32>
    %88 = math.tanh %87 : vector<32x256xf32>
    %cst_42 = arith.constant 1.000000e+00 : f32
    %89 = vector.broadcast %cst_42 : f32 to vector<32x256xf32>
    %90 = arith.addf %89, %88 : vector<32x256xf32>
    %cst_43 = arith.constant 5.000000e-01 : f32
    %91 = vector.broadcast %cst_43 : f32 to vector<32x256xf32>
    %92 = arith.mulf %91, %90 : vector<32x256xf32>
    %93 = arith.mulf %80, %92 : vector<32x256xf32>
    %94 = arith.addf %73, %93 : vector<32x256xf32>
    %c0_44 = arith.constant 0 : index
    %c0_45 = arith.constant 0 : index
    %95 = vector.load %arg7[%c0_44, %c0_45] : memref<2x32xf32, #tpu.memory_space<vmem>>, vector<2x32xf32>
    %cst_46 = arith.constant dense<0.000000e+00> : vector<2x256xf32>
    %96 = tpu.matmul %95, %94, %cst_46 {dimension_numbers = #tpu.dot_dimension_numbers<[1], [0], [0], [1], [0, 0, 1, 1], [], []>} : vector<2x32xf32>, vector<32x256xf32>, vector<2x256xf32> -> vector<2x256xf32>
    %c0_47 = arith.constant 0 : index
    %c0_48 = arith.constant 0 : index
    %97 = vector.load %arg8[%c0_47, %c0_48] : memref<2x1xf32, #tpu.memory_space<vmem>>, vector<2x1xf32>
    %98 = vector.broadcast %97 : vector<2x1xf32> to vector<2x256xf32>
    %99 = arith.addf %96, %98 : vector<2x256xf32>
    %c0_49 = arith.constant 0 : index
    %c0_50 = arith.constant 0 : index
    %100 = vector.load %arg9[%c0_49, %c0_50] : memref<2x256xf32, #tpu.memory_space<vmem>>, vector<2x256xf32>
    tpu.vector_store %arg9[%c0_49, %c0_50], %99 {strides = array<i32>} : memref<2x256xf32, #tpu.memory_space<vmem>>, vector<2x256xf32>,
    return
  }
  func.func @transform_0(%arg0: i32) -> (i32, i32) {
    %c0_i32 = arith.constant 0 : i32
    %c0_i32_0 = arith.constant 0 : i32
    return %c0_i32, %arg0 : i32, i32
  }
  func.func @transform_1(%arg0: i32) -> (i32, i32) {
    %c0_i32 = arith.constant 0 : i32
    %c0_i32_0 = arith.constant 0 : i32
    %c0_i32_1 = arith.constant 0 : i32
    return %c0_i32, %c0_i32_0 : i32, i32
  }
  func.func @transform_2(%arg0: i32) -> (i32, i32) {
    %c0_i32 = arith.constant 0 : i32
    %c0_i32_0 = arith.constant 0 : i32
    %c0_i32_1 = arith.constant 0 : i32
    return %c0_i32, %c0_i32_0 : i32, i32
  }
  func.func @transform_3(%arg0: i32) -> (i32, i32) {
    %c0_i32 = arith.constant 0 : i32
    %c0_i32_0 = arith.constant 0 : i32
    %c0_i32_1 = arith.constant 0 : i32
    return %c0_i32, %c0_i32_0 : i32, i32
  }
  func.func @transform_4(%arg0: i32) -> (i32, i32, i32) {
    %c0_i32 = arith.constant 0 : i32
    %c0_i32_0 = arith.constant 0 : i32
    %c0_i32_1 = arith.constant 0 : i32
    %c0_i32_2 = arith.constant 0 : i32
    return %c0_i32, %c0_i32_0, %c0_i32_1 : i32, i32, i32
  }
  func.func @transform_5(%arg0: i32) -> (i32, i32, i32) {
    %c0_i32 = arith.constant 0 : i32
    %c0_i32_0 = arith.constant 0 : i32
    %c0_i32_1 = arith.constant 0 : i32
    %c0_i32_2 = arith.constant 0 : i32
    return %c0_i32, %c0_i32_0, %c0_i32_1 : i32, i32, i32
  }
  func.func @transform_6(%arg0: i32) -> (i32, i32) {
    %c0_i32 = arith.constant 0 : i32
    %c0_i32_0 = arith.constant 0 : i32
    %c0_i32_1 = arith.constant 0 : i32
    return %c0_i32, %c0_i32_0 : i32, i32
  }
  func.func @transform_7(%arg0: i32) -> (i32, i32) {
    %c0_i32 = arith.constant 0 : i32
    %c0_i32_0 = arith.constant 0 : i32
    %c0_i32_1 = arith.constant 0 : i32
    return %c0_i32, %c0_i32_0 : i32, i32
  }
  func.func @transform_8(%arg0: i32) -> (i32, i32) {
    %c0_i32 = arith.constant 0 : i32
    %c0_i32_0 = arith.constant 0 : i32
    return %c0_i32, %arg0 : i32, i32
  }
}

</mosaic_0001>

<bundles_post_ra>
// kernel: tpu_custom_call.1
= control target key start
LH: loop header
LB: loop body
LE: loop exit
PB: predicated region body
PF: predicated region fallthrough
CT: control target
= control target key end

     0   :  { %v2982_v1 = vmov 0   ;;  %s4487_s0 = inlined_call_operand.vmem [shape: f32[2,256], index: 0, kind: input, shape index: {}]   ;;  %s4488_s1 = inlined_call_operand.vmem [shape: f32[16,1], index: 1, kind: input, shape index: {}]   ;;  %s4489_s2 = inlined_call_operand.vmem [shape: f32[32,64], index: 2, kind: input, shape index: {}]   ;;  %s4490_s3 = inlined_call_operand.vmem [shape: f32[32,1], index: 3, kind: input, shape index: {}]   ;;  %s4491_s4 = inlined_call_operand.vmem [shape: f32[3,32,32], index: 4, kind: input, shape index: {}]   ;;  %s4492_s5 = inlined_call_operand.vmem [shape: f32[3,32,1], index: 5, kind: input, shape index: {}]   ;;  %s4493_s6 = inlined_call_operand.vmem [shape: f32[2,32], index: 6, kind: input, shape index: {}]   ;;  %s4494_s7 = inlined_call_operand.vmem [shape: f32[2,1], index: 7, kind: input, shape index: {}]   ;;  %s4495_s8 = inlined_call_operand.hbm [shape: f32[2,256], index: 8, kind: output, shape index: {}]  }
   0x1   :  { %v30_v0 = vld [vmem:[%s4488_s1] sm:$0xff]  ;;  %2860 = vset.pattern.permute.xlu0 %v2982_v1  ;;  %2861 = vset.pattern.permute.xlu1 %v2982_v1  ;;  %v31_v2 = vld [vmem:[%s4488_s1 + $0x8] sm:$0xff] }
   0x2   :  { %35 = vperm.xlu0 %2860, %v30_v0  }
   0x3   :  { %13 = vsyncpa [#allocation3], 0  ;;  %v1737_v3 = vld [vmem:[%s4490_s3 + $0x10] sm:$0xff]  ;;  %v1937_v4 = vld [vmem:[%s4492_s5] sm:$0xff]  ;;  %v44_v11 = vlaneseq  ;;  %s2990_s24 = smov [#allocation2]  }
   0x4   :  { %v1939_v5 = vld [vmem:[%s4492_s5 + $0x10] sm:$0xff]  ;;  %v2749_v6 = vld [vmem:[%s4492_s5 + $0x20] sm:$0xff]  ;;  %s2664_s25 = sshll.u32 %s2990_s24, 4  ;;  %s2665_s25 = int_to_ptr.vmem [resolvable:$true] %s2664_s25 }
   0x5   :  { %v2751_v7 = vld [vmem:[%s4492_s5 + $0x30] sm:$0xff]  ;;  %v2761_v8 = vld [vmem:[%s4492_s5 + $0x40] sm:$0xff]  ;;  %v45_v12 = vshrl.u32 %v44_v11, 7  ;;  %s2958_s26 = scalar_lea.vmem %s2665_s25, 64  ;;  %p2963_p1 = scmp.lt.s32.totalorder %s2665_s25, %s2665_s25 }
   0x6   :  { %40 = vperm.xlu0 %2860, %v31_v2   ;;  %v2763_v9 = vld [vmem:[%s4492_s5 + $0x50] sm:$0xff]  ;;  %v2566_v10 = vld [vmem:[%s4494_s7] sm:$0x3]  ;;  %p2959_p0 = scmp.ne.s32.totalorder %s2665_s25, %s2958_s26  ;;  %p2964_p2 = scmp.lt.s32.totalorder %s2958_s26, %s2958_s26 }
   0x7   :  { %v46_v13 = vsub.s32 0, %v45_v12  ;;  %v50_v14 = vsub.s32 1, %v45_v12  ;;  %v32_v15 = vld [vmem:[%s4487_s0] ss:$2 sm:$0x3] }
   0x8   :  { %v2672_v16 = vld [vmem:[%s4487_s0 + $0x1] ss:$2 sm:$0x3]  ;;  %v4506_v12 = vmov 2102212464   ;;  %p2965_p3 = por %p2964_p2, %p2963_p1 }
   0x9   :  { %v51_v17 = vrot.slane %v32_v15, %v50_v14  ;;  %v64_v18 = vrot.slane %v2672_v16, %v46_v13  ;;  %v68_v19 = vrot.slane %v2672_v16, %v50_v14  ;;  %v47_v20 = vrot.slane %v32_v15, %v46_v13 }
   0xa   :  { %1751 = vperm.xlu0 %2860, %v1737_v3   ;;  %v4509_v14 = vmov 920167782   ;;  %v4502_v16 = vmov 2131351028   ;;  %p2966_p4 = pnand %p2965_p3, %p2959_p0 }
   0xe   :  { %1943 = vperm.xlu0 %2860, %v1937_v4  }
  0x12   :  { %1953 = vperm.xlu0 %2860, %v1939_v5  }
  0x16   :  { %2155 = vperm.xlu0 %2860, %v2749_v6  }
  0x1a   :  { %2165 = vperm.xlu0 %2860, %v2751_v7  }
  0x1e   :  { %2366 = vperm.xlu0 %2860, %v2761_v8  }
  0x22   :  { %2376 = vperm.xlu0 %2860, %v2763_v9  }
  0x26   :  { %2569 = vperm.xlu0 %2860, %v2566_v10   ;;  %v4500_v10 = vmov 2475754826  }
  0x81   :  { %v36_v21 = vpop.permute.xlu0 %35 }
  0x82   :  { %v3072_v22 = vmul.f32 %v51_v17, %v36_v21  ;;  %v3074_v23 = vmul.f32 %v64_v18, %v36_v21  ;;  %v3076_v24 = vmul.f32 %v68_v19, %v36_v21  ;;  %v3078_v25 = vmul.f32 %v47_v20, %v36_v21 }
  0x84   :  { %v182_v26 = vand.u32 2139095040, %v3072_v22  ;;  %v906_v27 = vand.u32 2139095040, %v3074_v23  ;;  %v1010_v30 = vand.u32 2139095040, %v3076_v24  ;;  %v78_v31 = vand.u32 2139095040, %v3078_v25 }
  0x85   :  { %v41_v28 = vpop.permute.xlu0 %40  ;;  %v179_v62 = vand.u32 2147483647, %v3072_v22  ;;  %v4496_v2 = vand.u32 2147483647, %v3078_v25 }
  0x86   :  { %v183_v29 = vshrl.u32 %v182_v26, 23  ;;  %v3084_v32 = vmul.f32 %v51_v17, %v41_v28  ;;  %v3086_v33 = vmul.f32 %v64_v18, %v41_v28  ;;  %v3088_v34 = vmul.f32 %v68_v19, %v41_v28 }
  0x87   :  { %v907_v36 = vshrl.u32 %v906_v27, 23  ;;  %v1011_v37 = vshrl.u32 %v1010_v30, 23  ;;  %v79_v38 = vshrl.u32 %v78_v31, 23  ;;  %v3091_v47 = vmul.f32 %v47_v20, %v41_v28 }
  0x88   :  { %4518 = vst [vmem:[#allocation5_spill] sm:$0xff] %v3086_v33  ;;  %v2677_v35 = vadd.s32 4294967169, %v183_v29  ;;  %v390_v39 = vand.u32 2139095040, %v3084_v32  ;;  %v1114_v55 = vand.u32 2139095040, %v3086_v33  ;;  %v1218_v56 = vand.u32 2139095040, %v3088_v34 }
  0x89   :  { %v2705_v41 = vadd.s32 4294967169, %v907_v36  ;;  %v2709_v42 = vadd.s32 4294967169, %v1011_v37  ;;  %v2673_v43 = vadd.s32 4294967169, %v79_v38  ;;  %v286_v52 = vand.u32 2139095040, %v3091_v47 }
  0x8a   :  { %v189_v40 = vadd.s32 1, %v2677_v35  ;;  %v391_v44 = vshrl.u32 %v390_v39, 23  ;;  %v1115_v0 = vshrl.u32 %v1114_v55, 23  ;;  %v3103_v1 = vshrl.u32 %v1218_v56, 23 }
  0x8b   :  { %v913_v45 = vadd.s32 1, %v2705_v41  ;;  %v1017_v46 = vadd.s32 1, %v2709_v42  ;;  %v85_v48 = vadd.s32 1, %v2673_v43  ;;  %v287_v61 = vshrl.u32 %v286_v52, 23 }
  0x8c   :  { %vm190_vm0 = vcmp.gt.s32.totalorder %v189_v40, 0  ;;  %v2685_v50 = vadd.s32 4294967169, %v391_v44  ;;  %v186_v21 = vand.u32 8388607, %v179_v62  ;;  %v4504_v26 = vmov 683565275  }
  0x8d   :  { %v191_v49 = vsel %vm190_vm0, %v189_v40, 0  ;;  %vm914_vm1 = vcmp.gt.s32.totalorder %v913_v45, 0  ;;  %vm1018_vm2 = vcmp.gt.s32.totalorder %v1017_v46, 0  ;;  %vm86_vm3 = vcmp.gt.s32.totalorder %v85_v48, 0 }
  0x8e   :  { %v193_v51 = vand.u32 31, %v191_v49  ;;  %v915_v53 = vsel %vm914_vm1, %v913_v45, 0  ;;  %v397_v54 = vadd.s32 1, %v2685_v50  ;;  %v1019_v57 = vsel %vm1018_vm2, %v1017_v46, 0 }
  0x8f   :  { %v3096_v58 = vsel %vm86_vm3, %v85_v48, 0  ;;  %v3098_v60 = vand.u32 31, %v915_v53  ;;  %v3101_v63 = vand.u32 31, %v1019_v57  ;;  %v3109_v4 = vshrl.u32 %v191_v49, 5 }
  0x90   :  { %v194_v59 = vsub.s32 32, %v193_v51  ;;  %vm398_vm4 = vcmp.gt.s32.totalorder %v397_v54, 0  ;;  %v3107_v3 = vand.u32 31, %v3096_v58  ;;  %v3111_v5 = vshrl.u32 %v915_v53, 5 }
  0x91   :  { %v3113_v6 = vshrl.u32 %v1019_v57, 5  ;;  %v3116_v7 = vsub.s32 32, %v3098_v60  ;;  %v2681_v8 = vadd.s32 4294967169, %v287_v61  ;;  %v399_v9 = vsel %vm398_vm4, %v397_v54, 0 }
  0x92   :  { %v197_v11 = vshrl.u32 %v4500_v10, %v194_v59  ;;  %v3121_v13 = vshll.u32 %v4506_v12, %v3098_v60  ;;  %v3125_v15 = vshll.u32 %v4509_v14, %v3098_v60  ;;  %v200_v17 = vshrl.u32 %v4502_v16, %v194_v59 }
  0x93   :  { %v203_v18 = vshrl.u32 %v4506_v12, %v194_v59  ;;  %v3130_v19 = vsub.s32 32, %v3101_v63  ;;  %v3134_v20 = vshll.u32 %v4506_v12, %v3101_v63  ;;  %v196_v27 = vshll.u32 %v4504_v26, %v193_v51 }
  0x94   :  { %v3141_v28 = vshll.u32 %v4509_v14, %v3101_v63  ;;  %v401_v29 = vand.u32 31, %v399_v9  ;;  %v199_v30 = vshll.u32 %v4500_v10, %v193_v51  ;;  %v202_v31 = vshll.u32 %v4502_v16, %v193_v51 }
  0x95   :  { %v3147_v35 = vshrl.u32 %v4509_v14, %v3116_v7  ;;  %v198_v36 = vor.u32 %v197_v11, %v196_v27  ;;  %v205_v37 = vshll.u32 %v4506_v12, %v193_v51  ;;  %v206_v38 = vshrl.u32 %v4509_v14, %v194_v59 }
  0x96   :  { %v201_v39 = vor.u32 %v200_v17, %v199_v30  ;;  %v204_v40 = vor.u32 %v203_v18, %v202_v31  ;;  %v208_v41 = vshll.u32 %v4509_v14, %v193_v51  ;;  %v4497_v42 = vmov 1326507024  }
  0x97   :  { %v209_v43 = vshrl.u32 %v4497_v42, %v194_v59  ;;  %v3155_v44 = vshrl.u32 %v4497_v42, %v3116_v7  ;;  %v187_v45 = vor.u32 8388608, %v186_v21  ;;  %v195_v46 = vshrl.u32 %v4504_v26, %v194_v59 }
  0x98   :  { %v207_v48 = vor.u32 %v206_v38, %v205_v37  ;;  %v293_v49 = vadd.s32 1, %v2681_v8  ;;  %v3158_v50 = vsub.s32 32, %v401_v29  ;;  %vm211_vm5 = vcmp.lt.s32.totalorder %v3109_v4, 1 }
  0x99   :  { %v210_v52 = vor.u32 %v209_v43, %v208_v41  ;;  %vm212_vm6 = vcmp.lt.s32.totalorder %v3109_v4, 2  ;;  %vm213_vm7 = vcmp.lt.s32.totalorder %v3109_v4, 3  ;;  %vm214_vm8 = vcmp.lt.s32.totalorder %v3109_v4, 4 }
  0x9a   :  { %v215_v51 = vsel %vm211_vm5, %v195_v46, %v198_v36  ;;  %v216_v53 = vsel %vm214_vm8, %v204_v40, 2102212464  ;;  %v219_v54 = vsel %vm211_vm5, %v198_v36, %v201_v39  ;;  %v220_v55 = vsel %vm214_vm8, %v207_v48, 920167782 }
  0x9b   :  { %v223_v56 = vsel %vm211_vm5, %v201_v39, %v204_v40  ;;  %v217_v57 = vsel %vm213_vm7, %v201_v39, %v216_v53  ;;  %v221_v59 = vsel %vm213_vm7, %v204_v40, %v220_v55  ;;  %v224_v61 = vsel %vm214_vm8, %v210_v52, 1326507024 }
  0x9c   :  { %v227_v8 = vshll.u32 %v187_v45, 8  ;;  %v3166_v11 = vshrl.u32 %v4509_v14, %v3130_v19  ;;  %v222_v17 = vsel %vm212_vm6, %v219_v54, %v221_v59  ;;  %v225_v18 = vsel %vm213_vm7, %v207_v48, %v224_v61 }
  0x9d   :  { %v4499_v21 = vand.u32 2147483647, %v3084_v32  ;;  %v2713_v27 = vadd.s32 4294967169, %v1115_v0  ;;  %v226_v30 = vsel %vm212_vm6, %v223_v56, %v225_v18  ;;  %v2717_v37 = vadd.s32 4294967169, %v3103_v1 }
  0x9e   :  { %v3173_v31 = vmul.u32.u64.low %v227_v8, %v222_v17  ;;  %v3174_v36 = vmul.u32.u64.high %v227_v8, %v222_v17, %v3173_v31  ;;  %v218_v38 = vsel %vm212_vm6, %v215_v51, %v217_v57  ;;  %v3183_v41 = vshrl.u32 %v399_v9, 5 }
  0x9f   :  { %v3180_v39 = vmul.u32.u64.low %v227_v8, %v226_v30  ;;  %v3181_v40 = vmul.u32.u64.high %v227_v8, %v226_v30, %v3180_v39  ;;  %v394_v0 = vand.u32 8388607, %v4499_v21  ;;  %v404_v43 = vshll.u32 %v4504_v26, %v401_v29 }
  0xa0   :  { %v405_v45 = vshrl.u32 %v4500_v10, %v3158_v50  ;;  %v407_v46 = vshll.u32 %v4500_v10, %v401_v29  ;;  %v408_v1 = vshrl.u32 %v4502_v16, %v3158_v50  ;;  %v410_v4 = vshll.u32 %v4502_v16, %v401_v29 }
  0xa1   :  { %v411_v48 = vshrl.u32 %v4506_v12, %v3158_v50  ;;  %vm294_vm9 = vcmp.gt.s32.totalorder %v293_v49, 0  ;;  %v234_v9 = vmul.u32 %v227_v8, %v218_v38  ;;  %v237_v52 = vadd.s32 1, %v3174_v36 }
  0xa2   :  { %v406_v51 = vor.u32 %v405_v45, %v404_v43  ;;  %vm236_vm10 = vc.u32 %v3181_v40, %v3173_v31  ;;  %v409_v53 = vor.u32 %v408_v1, %v407_v46  ;;  %v413_v55 = vshll.u32 %v4506_v12, %v401_v29 }
  0xa3   :  { %v412_v54 = vor.u32 %v411_v48, %v410_v4  ;;  %v238_v56 = vsel %vm236_vm10, %v237_v52, %v3174_v36  ;;  %v414_v57 = vshrl.u32 %v4509_v14, %v3158_v50  ;;  %v416_v59 = vshll.u32 %v4509_v14, %v401_v29 }
  0xa4   :  { %v417_v61 = vshrl.u32 %v4497_v42, %v3158_v50  ;;  %v295_v8 = vsel %vm294_vm9, %v293_v49, 0  ;;  %v239_v17 = vadd.s32 %v238_v56, %v234_v9  ;;  %v395_v18 = vor.u32 8388608, %v394_v0 }
  0xa5   :  { %vm419_vm11 = vcmp.lt.s32.totalorder %v3183_v41, 1  ;;  %v415_v30 = vor.u32 %v414_v57, %v413_v55  ;;  %vm420_vm12 = vcmp.lt.s32.totalorder %v3183_v41, 2  ;;  %vm421_vm13 = vcmp.lt.s32.totalorder %v3183_v41, 3 }
  0xa6   :  { %v418_v38 = vor.u32 %v417_v61, %v416_v59  ;;  %v240_v36 = vadd.s32 536870912, %v239_v17  ;;  %vm422_vm14 = vcmp.lt.s32.totalorder %v3183_v41, 4  ;;  %v427_v29 = vsel %vm419_vm11, %v406_v51, %v409_v53 }
  0xa7   :  { %v431_v39 = vsel %vm419_vm11, %v409_v53, %v412_v54  ;;  %v1037_v49 = vshrl.u32 %v4497_v42, %v3130_v19  ;;  %v424_v0 = vsel %vm422_vm14, %v412_v54, 2102212464  ;;  %v428_v43 = vsel %vm422_vm14, %v415_v30, 920167782 }
  0xa8   :  { %v432_v45 = vsel %vm422_vm14, %v418_v38, 1326507024  ;;  %v3216_v46 = vshrl.u32 %v240_v36, 30  ;;  %v429_v1 = vsel %vm421_vm13, %v412_v54, %v428_v43  ;;  %v435_v48 = vshll.u32 %v395_v18, 8 }
  0xa9   :  { %v433_v4 = vsel %vm421_vm13, %v415_v30, %v432_v45  ;;  %v1121_v9 = vadd.s32 1, %v2713_v27  ;;  %v403_v52 = vshrl.u32 %v4504_v26, %v3158_v50  ;;  %v430_v55 = vsel %vm420_vm12, %v427_v29, %v429_v1 }
  0xaa   :  { %v434_v56 = vsel %vm420_vm12, %v431_v39, %v433_v4  ;;  %v1225_v57 = vadd.s32 1, %v2717_v37  ;;  %v242_v59 = vshll.u32 %v3216_v46, 30  ;;  %v425_v27 = vsel %vm421_vm13, %v409_v53, %v424_v0 }
  0xab   :  { %v3229_v61 = vmul.u32.u64.low %v435_v48, %v434_v56  ;;  %v3230_v38 = vmul.u32.u64.high %v435_v48, %v434_v56, %v3229_v61  ;;  %v423_v54 = vsel %vm419_vm11, %v403_v52, %v406_v51  ;;  %v3241_v30 = vshrl.u32 %v3096_v58, 5 }
  0xac   :  { %v3236_v18 = vmul.u32.u64.low %v435_v48, %v430_v55  ;;  %v3237_v50 = vmul.u32.u64.high %v435_v48, %v430_v55, %v3236_v18  ;;  %v3245_v37 = vor.u32 %v3147_v35, %v3121_v13  ;;  %v934_v36 = vor.u32 %v3155_v44, %v3125_v15 }
  0xad   :  { %v3249_v29 = vsub.s32 %v239_v17, %v242_v59  ;;  %v3252_v51 = vsub.s32 32, %v3107_v3  ;;  %vm938_vm15 = vcmp.lt.s32.totalorder %v3111_v5, 4  ;;  %v3257_v53 = vor.u32 %v3166_v11, %v3134_v20 }
  0xae   :  { %v1038_v58 = vor.u32 %v1037_v49, %v3141_v28  ;;  %v3260_v39 = vand.u32 31, %v295_v8  ;;  %v426_v15 = vsel %vm420_vm12, %v423_v54, %v425_v27  ;;  %vm444_vm0 = vc.u32 %v3230_v38, %v3236_v18 }
  0xaf   :  { %v245_v13 = vsub.s32 0, %v3249_v29  ;;  %vm1042_vm1 = vcmp.lt.s32.totalorder %v3113_v6, 4  ;;  %vm1122_vm2 = vcmp.gt.s32.totalorder %v1121_v9, 0  ;;  %vm1226_vm3 = vcmp.gt.s32.totalorder %v1225_v57, 0 }
  0xb0   :  { %v445_v35 = vadd.s32 1, %v3237_v50  ;;  %v3272_v20 = vsel %vm938_vm15, %v3245_v37, 920167782  ;;  %v3276_v28 = vsel %vm938_vm15, %v934_v36, 1326507024  ;;  %v3278_v44 = vshrl.u32 %v295_v8, 5 }
  0xb1   :  { %v2678_v11 = vmin.u32 %v245_v13, %v3249_v29  ;;  %v3284_v41 = vsel %vm1042_vm1, %v3257_v53, 920167782  ;;  %v3288_v17 = vsel %vm1042_vm1, %v1038_v58, 1326507024  ;;  %v442_v49 = vmul.u32 %v435_v48, %v426_v15 }
  0xb2   :  { %v446_v0 = vsel %vm444_vm0, %v445_v35, %v3237_v50  ;;  %v3292_v43 = vsub.s32 32, %v3260_v39  ;;  %v1123_v45 = vsel %vm1122_vm2, %v1121_v9, 0  ;;  %v1227_v8 = vsel %vm1226_vm3, %v1225_v57, 0 }
  0xb3   :  { %v247_v1 = vclz %v2678_v11  ;;  %v235_v4 = vadd.s32 %v3173_v31, %v3181_v40  ;;  %v447_v52 = vadd.s32 %v446_v0, %v442_v49  ;;  %v93_v55 = vshrl.u32 %v4500_v10, %v3252_v51 }
  0xb4   :  { %v96_v56 = vshrl.u32 %v4502_v16, %v3252_v51  ;;  %v99_v48 = vshrl.u32 %v4506_v12, %v3252_v51  ;;  %v101_v61 = vshll.u32 %v4506_v12, %v3107_v3  ;;  %v102_v9 = vshrl.u32 %v4509_v14, %v3252_v51 }
  0xb5   :  { %v2679_v59 = vadd.s32 4294967294, %v247_v1  ;;  %v448_v57 = vadd.s32 536870912, %v447_v52  ;;  %v82_v31 = vand.u32 8388607, %v4496_v2  ;;  %v92_v40 = vshll.u32 %v4504_v26, %v3107_v3 }
  0xb6   :  { %v105_v54 = vshrl.u32 %v4497_v42, %v3252_v51  ;;  %v95_v27 = vshll.u32 %v4500_v10, %v3107_v3  ;;  %v98_v50 = vshll.u32 %v4502_v16, %v3107_v3  ;;  %v103_v36 = vor.u32 %v102_v9, %v101_v61 }
  0xb7   :  { %vm2680_vm4 = vcmp.lt.s32.totalorder %v2679_v59, 0  ;;  %v449_v13 = vshrl.u32 %v448_v57, 30  ;;  %v94_v15 = vor.u32 %v93_v55, %v92_v40  ;;  %v104_v35 = vshll.u32 %v4509_v14, %v3107_v3 }
  0xb8   :  { %v250_v58 = vsel %vm2680_vm4, 0, %v2679_v59  ;;  %v97_v0 = vor.u32 %v96_v56, %v95_v27  ;;  %v100_v1 = vor.u32 %v99_v48, %v98_v50  ;;  %v3318_v2 = vshrl.u32 %v1123_v45, 5 }
  0xb9   :  { %v251_v11 = vsub.s32 32, %v250_v58  ;;  %v255_v49 = vsub.s32 4294967266, %v250_v58  ;;  %v450_v42 = vshll.u32 %v449_v13, 30  ;;  %v106_v21 = vor.u32 %v105_v54, %v104_v35 }
  0xba   :  { %vm110_vm5 = vcmp.lt.s32.totalorder %v3241_v30, 4  ;;  %v252_v10 = vshll.u32 %v3249_v29, %v250_v58  ;;  %v83_v3 = vor.u32 8388608, %v82_v31  ;;  %vm107_vm6 = vcmp.lt.s32.totalorder %v3241_v30, 1 }
  0xbb   :  { %v253_v16 = vshrl.u32 %v235_v4, %v251_v11  ;;  %v256_v61 = vadd.s32 127, %v255_v49  ;;  %v116_v55 = vsel %vm110_vm5, %v103_v36, 920167782  ;;  %v3324_v59 = vsub.s32 %v447_v52, %v450_v42 }
  0xbc   :  { %vm109_vm7 = vcmp.lt.s32.totalorder %v3241_v30, 3  ;;  %vm181_vm8 = vcmp.lt.s32.totalorder %v3072_v22, 0  ;;  %v115_v9 = vsel %vm107_vm6, %v94_v15, %v97_v0  ;;  %v3333_v4 = vand.u32 31, %v1123_v45 }
  0xbd   :  { %v254_v56 = vor.u32 %v253_v16, %v252_v10  ;;  %v257_v48 = vshll.u32 %v256_v61, 23  ;;  %v117_v29 = vsel %vm109_vm7, %v100_v1, %v116_v55  ;;  %v453_v42 = vsub.s32 0, %v3324_v59 }
  0xbe   :  { %4519 = vst [vmem:[#allocation6_spill] sm:$0xff] %v3333_v4  ;;  %v119_v52 = vsel %vm107_vm6, %v97_v0, %v100_v1  ;;  %v120_v57 = vsel %vm110_vm5, %v106_v21, 1326507024  ;;  %v3340_v31 = vshrl.u32 %v1227_v8, 5  ;;  %vm108_vm9 = vcmp.lt.s32.totalorder %v3241_v30, 2 }
  0xbf   :  { %v258_v10 = vor.u32 4788187, %v257_v48  ;;  %v121_v16 = vsel %vm109_vm7, %v103_v36, %v120_v57  ;;  %vm3347_vm10 = vcmp.le.f32.partialorder %v179_v62, 0.7853982  ;;  %v2686_v40 = vmin.u32 %v453_v42, %v3324_v59 }
  0xc0   :  { %v91_v54 = vshrl.u32 %v4504_v26, %v3252_v51  ;;  %v112_v21 = vsel %vm110_vm5, %v100_v1, 2102212464  ;;  %v118_v27 = vsel %vm108_vm9, %v115_v9, %v117_v29  ;;  %v261_v58 = vcvt.s32.f32 %v254_v56 }
  0xc1   :  { %v259_v50 = vand.u32 2147483647, %v258_v10  ;;  %v122_v36 = vsel %vm108_vm9, %v119_v52, %v121_v16  ;;  %v123_v62 = vshll.u32 %v83_v3, 8  ;;  %v3360_v35 = vand.u32 31, %v1227_v8 }
  0xc2   :  { %v265_v11 = vsub.s32 4, %v3216_v46  ;;  %v455_v49 = vclz %v2686_v40  ;;  %v473_v61 = vsub.s32 4, %v449_v13  ;;  %v111_v51 = vsel %vm107_vm6, %v91_v54, %v94_v15 }
  0xc3   :  { %v262_v55 = vmul.f32 %v261_v58, %v259_v50  ;;  %v3365_v1 = vmul.u32.u64.low %v123_v62, %v122_v36  ;;  %v3366_v48 = vmul.u32.u64.high %v123_v62, %v122_v36, %v3365_v1  ;;  %v113_v56 = vsel %vm109_vm7, %v97_v0, %v112_v21 }
  0xc4   :  { %v2687_v9 = vadd.s32 4294967294, %v455_v49  ;;  %v3370_v29 = vmul.u32.u64.low %v123_v62, %v118_v27  ;;  %v3371_v42 = vmul.u32.u64.high %v123_v62, %v118_v27, %v3370_v29  ;;  %v3375_v8 = vsub.s32 32, %v3333_v4 }
  0xc5   :  { %v3379_v3 = vshll.u32 %v4506_v12, %v3333_v4  ;;  %v263_v52 = vxor.u32 2147483648, %v262_v55  ;;  %vm389_vm11 = vcmp.lt.s32.totalorder %v3084_v32, 0  ;;  %v3383_v15 = vsub.s32 32, %v3360_v35 }
  0xc6   :  { %v266_v0 = vsel %vm181_vm8, %v265_v11, %v3216_v46  ;;  %vm2688_vm12 = vcmp.lt.s32.totalorder %v2687_v9, 0  ;;  %v474_v57 = vsel %vm389_vm11, %v473_v61, %v449_v13  ;;  %v4523_v16 = vand.u32 2147483647, %v3084_v32 }
  0xc7   :  { %4522 = vst [vmem:[#allocation7_spill] sm:$0xff] %v3379_v3  ;;  %v264_v10 = vsel %vm181_vm8, %v263_v52, %v262_v55  ;;  %v458_v54 = vsel %vm2688_vm12, 0, %v2687_v9  ;;  %v114_v21 = vsel %vm108_vm9, %v111_v51, %v113_v56  ;;  %v443_v46 = vadd.s32 %v3236_v18, %v3230_v38 }
  0xc8   :  { %vm3394_vm13 = vcmp.le.f32.partialorder %v4523_v16, 0.7853982  ;;  %v459_v27 = vsub.s32 32, %v458_v54  ;;  %v463_v50 = vsub.s32 4294967266, %v458_v54  ;;  %vm132_vm14 = vc.u32 %v3366_v48, %v3370_v29 }
  0xc9   :  { %v267_v13 = vsel %vm3347_vm10, %v3072_v22, %v264_v10  ;;  %v3409_v58 = vsel %vm3347_vm10, 0, %v266_v0  ;;  %v3413_v30 = vsel %vm3394_vm13, 0, %v474_v57  ;;  %v133_v36 = vadd.s32 1, %v3371_v42 }
  0xca   :  { %v460_v38 = vshll.u32 %v3324_v59, %v458_v54  ;;  %v461_v18 = vshrl.u32 %v443_v46, %v459_v27  ;;  %v464_v11 = vadd.s32 127, %v463_v50  ;;  %v130_v49 = vmul.u32 %v123_v62, %v114_v21 }
  0xcb   :  { %v134_v61 = vsel %vm132_vm14, %v133_v36, %v3371_v42  ;;  %v4508_v55 = vand.u32 2147483647, %v3091_v47  ;;  %v300_v45 = vshll.u32 %v4504_v26, %v3260_v39  ;;  %v4526_v51 = vmov 2475754826  }
  0xcc   :  { %v301_v1 = vshrl.u32 %v4526_v51, %v3292_v43  ;;  %2862 = vcosq.f32 %v267_v13  ;;  %v462_v9 = vor.u32 %v461_v18, %v460_v38  ;;  %v465_v56 = vshll.u32 %v464_v11, 23 }
  0xcd   :  { %v135_v52 = vadd.s32 %v134_v61, %v130_v49  ;;  %v4527_v0 = vmov 2131351028   ;;  %v307_v62 = vshrl.u32 %v4506_v12, %v3292_v43  ;;  %v309_v42 = vshll.u32 %v4506_v12, %v3260_v39 }
  0xce   :  { %v304_v59 = vshrl.u32 %v4527_v0, %v3292_v43  ;;  %v310_v57 = vshrl.u32 %v4509_v14, %v3292_v43  ;;  %v466_v10 = vor.u32 4788187, %v465_v56  ;;  %v312_v54 = vshll.u32 %v4509_v14, %v3260_v39 }
  0xcf   :  { %v136_v16 = vadd.s32 536870912, %v135_v52  ;;  %v4528_v21 = vmov 1326507024   ;;  %2864 = vsinq.f32 %v267_v13  ;;  %v469_v27 = vcvt.s32.f32 %v462_v9 }
  0xd0   :  { %v313_v46 = vshrl.u32 %v4528_v21, %v3292_v43  ;;  %v303_v50 = vshll.u32 %v4526_v51, %v3260_v39  ;;  %v306_v36 = vshll.u32 %v4527_v0, %v3260_v39  ;;  %v467_v38 = vand.u32 2147483647, %v466_v10 }
  0xd1   :  { %v3439_v18 = vshrl.u32 %v136_v16, 30  ;;  %v311_v11 = vor.u32 %v310_v57, %v309_v42  ;;  %v3443_v61 = vshll.u32 %v4509_v14, %v3333_v4  ;;  %v1241_v56 = vshll.u32 %v4506_v12, %v3360_v35 }
  0xd2   :  { %v314_v49 = vor.u32 %v313_v46, %v312_v54  ;;  %v290_v13 = vand.u32 8388607, %v4508_v55  ;;  %v302_v9 = vor.u32 %v301_v1, %v300_v45  ;;  %v470_v26 = vmul.f32 %v469_v27, %v467_v38 }
  0xd3   :  { %4529 = vst [vmem:[#allocation8_spill] sm:$0xff] %v3443_v61  ;;  %v138_v3 = vshll.u32 %v3439_v18, 30  ;;  %v305_v39 = vor.u32 %v304_v59, %v303_v50  ;;  %v308_v10 = vor.u32 %v307_v62, %v306_v36  ;;  %v1242_v42 = vshrl.u32 %v4509_v14, %v3383_v15 }
  0xd4   :  { %v272_v57 = vadd.s32 3, %v3409_v58  ;;  %v480_v16 = vadd.s32 3, %v3413_v30  ;;  %vm318_vm0 = vcmp.lt.s32.totalorder %v3278_v44, 4  ;;  %v471_v54 = vxor.u32 2147483648, %v470_v26 }
  0xd5   :  { %v3455_v46 = vsub.s32 %v135_v52, %v138_v3  ;;  %v324_v12 = vsel %vm318_vm0, %v311_v11, 920167782  ;;  %v328_v55 = vsel %vm318_vm0, %v314_v49, 1326507024  ;;  %v291_v45 = vor.u32 8388608, %v290_v13 }
  0xd6   :  { %v4530_v1 = vmov 683565275   ;;  %vm315_vm2 = vcmp.lt.s32.totalorder %v3278_v44, 1  ;;  %vm317_vm3 = vcmp.lt.s32.totalorder %v3278_v44, 3  ;;  %v3461_v59 = vpop.eup %2862  ;;  %v472_v62 = vsel %vm389_vm11, %v471_v54, %v470_v26 }
  0xd7   :  { %v299_v27 = vshrl.u32 %v4530_v1, %v3292_v43  ;;  %v141_v50 = vsub.s32 0, %v3455_v46  ;;  %v320_v36 = vsel %vm318_vm0, %v308_v10, 2102212464  ;;  %v323_v3 = vsel %vm315_vm2, %v302_v9, %v305_v39 }
  0xd8   :  { %v475_v52 = vsel %vm3394_vm13, %v3084_v32, %v472_v62  ;;  %v325_v43 = vsel %vm317_vm3, %v308_v10, %v324_v12  ;;  %v327_v38 = vsel %vm315_vm2, %v305_v39, %v308_v10  ;;  %v329_v49 = vsel %vm317_vm3, %v311_v11, %v328_v55 }
  0xd9   :  { %v273_v26 = vand.u32 3, %v272_v57  ;;  %2866 = vcosq.f32 %v475_v52  ;;  %v3477_v13 = vand.u32 3, %v480_v16  ;;  %v2674_v54 = vmin.u32 %v141_v50, %v3455_v46  ;;  %v3480_v14 = vpop.eup %2864 }
  0xda   :  { %2868 = vsinq.f32 %v475_v52  ;;  %vm316_vm4 = vcmp.lt.s32.totalorder %v3278_v44, 2  ;;  %v319_v12 = vsel %vm315_vm2, %v299_v27, %v302_v9  ;;  %v321_v40 = vsel %vm317_vm3, %v305_v39, %v320_v36 }
  0xdb   :  { %v143_v10 = vclz %v2674_v54  ;;  %v326_v55 = vsel %vm316_vm4, %v323_v3, %v325_v43  ;;  %v330_v11 = vsel %vm316_vm4, %v327_v38, %v329_v49  ;;  %v331_v57 = vshll.u32 %v291_v45, 8 }
  0xdc   :  { %v3491_v16 = vor.u32 %v1242_v42, %v1241_v56  ;;  %v4531_v62 = vmov 920167782   ;;  %v3499_v9 = vshrl.u32 %v4528_v21, %v3383_v15  ;;  %v4511_v39 = vxor.u32 2147483648, %v3461_v59 }
  0xdd   :  { %v3495_v50 = vshll.u32 %v4531_v62, %v3360_v35  ;;  %vm274_vm5 = vcmp.lt.s32.totalorder %v273_v26, 2  ;;  %v4512_v27 = vxor.u32 2147483648, %v3480_v14  ;;  %v2675_v36 = vadd.s32 4294967294, %v143_v10 }
  0xde   :  { %v3503_v3 = vmul.u32.u64.low %v331_v57, %v330_v11  ;;  %v3504_v52 = vmul.u32.u64.high %v331_v57, %v330_v11, %v3503_v3  ;;  %vm275_vm6 = vcmp.eq.s32.totalorder %v273_v26, 0  ;;  %v322_v56 = vsel %vm316_vm4, %v319_v12, %v321_v40 }
  0xdf   :  { %v3508_v42 = vmul.u32.u64.low %v331_v57, %v326_v55  ;;  %v3509_v45 = vmul.u32.u64.high %v331_v57, %v326_v55, %v3508_v42  ;;  %vm278_vm7 = vcmp.eq.s32.totalorder %v273_v26, 2  ;;  %vm482_vm8 = vcmp.lt.s32.totalorder %v3477_v13, 2 }
  0xe0   :  { %vm483_vm9 = vcmp.eq.s32.totalorder %v3477_v13, 0  ;;  %vm2676_vm10 = vcmp.lt.s32.totalorder %v2675_v36, 0  ;;  %vm271_vm11 = vweird.f32 %v3072_v22  ;;  %v280_v43 = vsel %vm278_vm7, %v4511_v39, %v3480_v14 }
  0xe1   :  { %vm479_vm12 = vweird.f32 %v3084_v32  ;;  %vm486_vm13 = vcmp.eq.s32.totalorder %v3477_v13, 2  ;;  %v131_v44 = vadd.s32 %v3370_v29, %v3366_v48  ;;  %v146_v38 = vsel %vm2676_vm10, 0, %v2675_v36  ;;  %v1938_v32 = vld [vmem:[%s4492_s5 + $0x8] sm:$0xff] }
  0xe2   :  { %v277_v49 = vsel %vm275_vm6, %v3461_v59, %v4512_v27  ;;  %v147_v54 = vsub.s32 32, %v146_v38  ;;  %v151_v12 = vsub.s32 4294967266, %v146_v38  ;;  %v338_v40 = vmul.u32 %v331_v57, %v322_v56 }
  0xe3   :  { %vm340_vm14 = vc.u32 %v3504_v52, %v3508_v42  ;;  %v341_v10 = vadd.s32 1, %v3509_v45  ;;  %v1024_v11 = vshll.u32 %v4530_v1, %v3101_v63  ;;  %v3531_v3 = vpop.eup %2866  ;;  %v148_v48 = vshll.u32 %v3455_v46, %v146_v38 }
  0xe4   :  { %v149_v29 = vshrl.u32 %v131_v44, %v147_v54  ;;  %v152_v36 = vadd.s32 127, %v151_v12  ;;  %v1025_v39 = vshrl.u32 %v4526_v51, %v3130_v19  ;;  %v3536_v57 = vpop.eup %2868  ;;  %v4517_v56 = vxor.u32 2147483648, %v3531_v3 }
  0xe5   :  { %v342_v27 = vsel %vm340_vm14, %v341_v10, %v3509_v45  ;;  %v1027_v55 = vshll.u32 %v4526_v51, %v3101_v63  ;;  %v1028_v4 = vshrl.u32 %v4527_v0, %v3130_v19  ;;  %v484_v61 = vxor.u32 2147483648, %v3536_v57 }
  0xe6   :  { %v150_v46 = vor.u32 %v149_v29, %v148_v48  ;;  %v153_v44 = vshll.u32 %v152_v36, 23  ;;  %v343_v38 = vadd.s32 %v342_v27, %v338_v40  ;;  %v281_v54 = vsel %vm274_vm5, %v277_v49, %v280_v43 }
  0xe7   :  { %v488_v12 = vsel %vm486_vm13, %v4517_v56, %v3536_v57  ;;  %v161_v45 = vsub.s32 4, %v3439_v18  ;;  %v4532_v10 = vand.u32 2147483647, %v3076_v24  ;;  %v485_v48 = vsel %vm483_vm9, %v3531_v3, %v484_v61 }
  0xe8   :  { %v154_v27 = vor.u32 4788187, %v153_v44  ;;  %v1026_v26 = vor.u32 %v1025_v39, %v1024_v11  ;;  %v1029_v43 = vor.u32 %v1028_v4, %v1027_v55  ;;  %v489_v49 = vsel %vm482_vm8, %v485_v48, %v488_v12 }
  0xe9   :  { %v1014_v33 = vand.u32 8388607, %v4532_v10  ;;  %v344_v40 = vadd.s32 536870912, %v343_v38  ;;  %v1030_v29 = vshll.u32 %v4527_v0, %v3101_v63  ;;  %v4533_v36 = vmov 2102212464  }
  0xea   :  { %v1031_v56 = vshrl.u32 %v4533_v36, %v3130_v19  ;;  %vm1250_vm0 = vcmp.lt.s32.totalorder %v3340_v31, 4  ;;  %v282_v10 = vsel %vm271_vm11, nan, %v281_v54  ;;  %v490_v44 = vsel %vm479_vm12, nan, %v489_v49 }
  0xeb   :  { %v155_v39 = vand.u32 2147483647, %v154_v27  ;;  %v157_v4 = vcvt.s32.f32 %v150_v46  ;;  %v1246_v13 = vor.u32 %v3499_v9, %v3495_v50  ;;  %v2771_v55 = vpack.c.bf16 %v490_v44, %v282_v10 }
  0xec   :  { %v3572_v11 = vshrl.u32 %v344_v40, 30  ;;  %v1032_v63 = vor.u32 %v1031_v56, %v1030_v29  ;;  %vm77_vm2 = vcmp.lt.s32.totalorder %v3078_v25, 0  ;;  %v1015_v48 = vor.u32 8388608, %v1014_v33 }
  0xed   :  { %v158_v12 = vmul.f32 %v157_v4, %v155_v39  ;;  %vm1039_vm3 = vcmp.lt.s32.totalorder %v3113_v6, 1  ;;  %v687_v54 = vand.u32 3, %v3409_v58  ;;  %2772 = vmatprep.subr.bf16.mxu0 %v2771_v55  ;;  %vm1041_vm4 = vcmp.lt.s32.totalorder %v3113_v6, 3 }
  0xee   :  { %v346_v49 = vshll.u32 %v3572_v11, 30  ;;  %v1047_v50 = vsel %vm1039_vm3, %v1026_v26, %v1029_v43  ;;  %v162_v9 = vsel %vm77_vm2, %v161_v45, %v3439_v18  ;;  %v1023_v56 = vshrl.u32 %v4530_v1, %v3130_v19 }
  0xef   :  { %vm1040_vm5 = vcmp.lt.s32.totalorder %v3113_v6, 2  ;;  %v1049_v33 = vsel %vm1041_vm4, %v1032_v63, %v3284_v41  ;;  %v1044_v46 = vsel %vm1042_vm1, %v1032_v63, 2102212464  ;;  %v1051_v18 = vsel %vm1039_vm3, %v1029_v43, %v1032_v63 }
  0xf0   :  { %v3590_v58 = vsub.s32 %v343_v38, %v346_v49  ;;  %v1050_v27 = vsel %vm1040_vm5, %v1047_v50, %v1049_v33  ;;  %v4534_v45 = vand.u32 2147483647, %v3078_v25  ;;  %v159_v40 = vxor.u32 2147483648, %v158_v12 }
  0xf1   :  { %v1053_v41 = vsel %vm1041_vm4, %v3257_v53, %v3288_v17  ;;  %v1055_v38 = vshll.u32 %v1015_v48, 8  ;;  %v3609_v29 = vand.u32 3, %v3413_v30  ;;  %v1043_v39 = vsel %vm1039_vm3, %v1023_v56, %v1026_v26 }
  0xf2   :  { %vm3600_vm6 = vcmp.le.f32.partialorder %v4534_v45, 0.7853982  ;;  %v349_v44 = vsub.s32 0, %v3590_v58  ;;  %v1045_v4 = vsel %vm1041_vm4, %v1029_v43, %v1044_v46  ;;  %v1054_v55 = vsel %vm1040_vm5, %v1051_v18, %v1053_v41 }
  0xf3   :  { %v3613_v10 = vsel %vm3600_vm6, 0, %v162_v9  ;;  %v3622_v53 = vmul.u32.u64.low %v1055_v38, %v1050_v27  ;;  %v3623_v17 = vmul.u32.u64.high %v1055_v38, %v1050_v27, %v3622_v53  ;;  %v3629_v30 = vsel %vm1250_vm0, %v3491_v16, 920167782 }
  0xf4   :  { %vm689_vm1 = vcmp.eq.s32.totalorder %v687_v54, 0  ;;  %vm692_vm7 = vcmp.eq.s32.totalorder %v687_v54, 2  ;;  %v2682_v63 = vmin.u32 %v349_v44, %v3590_v58  ;;  %v160_v26 = vsel %vm77_vm2, %v159_v40, %v158_v12 }
  0xf5   :  { %v168_v43 = vadd.s32 3, %v3613_v10  ;;  %v3635_v48 = vmul.u32.u64.low %v1055_v38, %v1054_v55  ;;  %v3636_v49 = vmul.u32.u64.high %v1055_v38, %v1054_v55, %v3635_v48  ;;  %v4537_v50 = vxor.u32 2147483648, %v3480_v14 }
  0xf6   :  { %v4538_v56 = vxor.u32 2147483648, %v3461_v59  ;;  %v351_v46 = vclz %v2682_v63  ;;  %v1046_v27 = vsel %vm1040_vm5, %v1043_v39, %v1045_v4  ;;  %v3648_v12 = vsel %vm1250_vm0, %v1246_v13, 1326507024 }
  0xf7   :  { %v691_v9 = vsel %vm689_vm1, %v3461_v59, %v4537_v50  ;;  %vm688_vm8 = vcmp.lt.s32.totalorder %v687_v54, 2  ;;  %vm895_vm9 = vcmp.eq.s32.totalorder %v3609_v29, 0  ;;  %v1065_v18 = vadd.s32 1, %v3623_v17 }
  0xf8   :  { %v694_v33 = vsel %vm692_vm7, %v4538_v56, %v3480_v14  ;;  %vm898_vm10 = vcmp.eq.s32.totalorder %v3609_v29, 2  ;;  %v163_v59 = vsel %vm3600_vm6, %v3078_v25, %v160_v26  ;;  %vm285_vm13 = vcmp.lt.s32.totalorder %v3091_v47, 0 }
  0xf9   :  { %v2683_v14 = vadd.s32 4294967294, %v351_v46  ;;  %v695_v6 = vsel %vm688_vm8, %v691_v9, %v694_v33  ;;  %v3657_v45 = vand.u32 3, %v168_v43  ;;  %v1062_v40 = vmul.u32 %v1055_v38, %v1046_v27 }
  0xfa   :  { %vm1064_vm14 = vc.u32 %v3636_v49, %v3622_v53  ;;  %vm894_vm2 = vcmp.lt.s32.totalorder %v3609_v29, 2  ;;  %v4539_v13 = vxor.u32 2147483648, %v3531_v3  ;;  %v339_v19 = vadd.s32 %v3508_v42, %v3504_v52 }
  0xfb   :  { %vm2684_vm3 = vcmp.lt.s32.totalorder %v2683_v14, 0  ;;  %v1066_v41 = vsel %vm1064_vm14, %v1065_v18, %v3623_v17  ;;  %2870 = vcosq.f32 %v163_v59  ;;  %v369_v39 = vsub.s32 4, %v3572_v11 }
  0xfc   :  { %v900_v54 = vsel %vm898_vm10, %v4539_v13, %v3536_v57  ;;  %v354_v44 = vsel %vm2684_vm3, 0, %v2683_v14  ;;  %v1067_v38 = vadd.s32 %v1066_v41, %v1062_v40  ;;  %2872 = vsinq.f32 %v163_v59 }
  0xfd   :  { %v355_v4 = vsub.s32 32, %v354_v44  ;;  %v359_v55 = vsub.s32 4294967266, %v354_v44  ;;  %v1215_v63 = vand.u32 2147483647, %v3088_v34  ;;  %v897_v26 = vsel %vm895_vm9, %v3531_v3, %v484_v61 }
  0xfe   :  { %v1068_v52 = vadd.s32 536870912, %v1067_v38  ;;  %v1233_v42 = vshrl.u32 %v4526_v51, %v3383_v15  ;;  %v1236_v17 = vshrl.u32 %v4527_v0, %v3383_v15  ;;  %v356_v43 = vshll.u32 %v3590_v58, %v354_v44 }
  0xff   :  { %v357_v48 = vshrl.u32 %v339_v19, %v355_v4  ;;  %v360_v50 = vadd.s32 127, %v359_v55  ;;  %v1239_v9 = vshrl.u32 %v4533_v36, %v3383_v15  ;;  %v370_v57 = vsel %vm285_vm13, %v369_v39, %v3572_v11 }
 0x100   :  { %v3685_v56 = vshrl.u32 %v1068_v52, 30  ;;  %v1232_v61 = vshll.u32 %v4530_v1, %v3360_v35  ;;  %v1235_v3 = vshll.u32 %v4526_v51, %v3360_v35  ;;  %v1222_v58 = vand.u32 8388607, %v1215_v63 }
 0x101   :  { %v358_v33 = vor.u32 %v357_v48, %v356_v43  ;;  %v361_v46 = vshll.u32 %v360_v50, 23  ;;  %v1238_v27 = vshll.u32 %v4527_v0, %v3360_v35  ;;  %v4540_v18 = vand.u32 2147483647, %v3091_v47 }
 0x102   :  { %v1070_v59 = vshll.u32 %v3685_v56, 30  ;;  %v1234_v14 = vor.u32 %v1233_v42, %v1232_v61  ;;  %v1237_v40 = vor.u32 %v1236_v17, %v1235_v3  ;;  %v3705_v41 = vand.u32 3, %v3613_v10 }
 0x103   :  { %vm3697_vm4 = vcmp.le.f32.partialorder %v4540_v18, 0.7853982  ;;  %v362_v13 = vor.u32 4788187, %v361_v46  ;;  %v1240_v44 = vor.u32 %v1239_v9, %v1238_v27  ;;  %v3709_v35 = vsel %vm271_vm11, nan, %v695_v6  ;;  %v1735_v6 = vld [vmem:[%s4490_s3] sm:$0xff] }
 0x104   :  { %v372_v19 = vsel %vm3697_vm4, 0, %v370_v57  ;;  %v901_v39 = vsel %vm894_vm2, %v897_v26, %v900_v54  ;;  %vm174_vm5 = vcmp.eq.s32.totalorder %v3657_v45, 2  ;;  %v3714_v4 = vsub.s32 %v1067_v38, %v1070_v59  ;;  %1741 = vperm.xlu1 %2861, %v1735_v6  }
 0x105   :  { %vm171_vm6 = vcmp.eq.s32.totalorder %v3657_v45, 0  ;;  %v363_v55 = vand.u32 2147483647, %v362_v13  ;;  %v365_v52 = vcvt.s32.f32 %v358_v33  ;;  %v1223_v42 = vor.u32 8388608, %v1222_v58  ;;  %v2871_v10 = vpop.eup %2870 }
 0x106   :  { %vm1247_vm1 = vcmp.lt.s32.totalorder %v3340_v31, 1  ;;  %v376_v17 = vadd.s32 3, %v372_v19  ;;  %v1073_v22 = vsub.s32 0, %v3714_v4  ;;  %vm1249_vm11 = vcmp.lt.s32.totalorder %v3340_v31, 3  ;;  %v2873_v54 = vpop.eup %2872 }
 0x107   :  { %v1255_v29 = vsel %vm1247_vm1, %v1234_v14, %v1237_v40  ;;  %v366_v38 = vmul.f32 %v365_v52, %v363_v55  ;;  %vm589_vm7 = vcmp.eq.s32.totalorder %v3705_v41, 2  ;;  %vm1248_vm8 = vcmp.lt.s32.totalorder %v3340_v31, 2  ;;  %v1738_v52 = vld [vmem:[%s4490_s3 + $0x18] sm:$0xff] }
 0x108   :  { %v1252_v26 = vsel %vm1250_vm0, %v1240_v44, 2102212464  ;;  %v1257_v43 = vsel %vm1249_vm11, %v1240_v44, %v3629_v30  ;;  %vm170_vm9 = vcmp.lt.s32.totalorder %v3657_v45, 2  ;;  %vm586_vm10 = vcmp.eq.s32.totalorder %v3705_v41, 0  ;;  %v1736_v30 = vld [vmem:[%s4490_s3 + $0x8] sm:$0xff] }
 0x109   :  { %v2710_v48 = vmin.u32 %v1073_v22, %v3714_v4  ;;  %v1231_v50 = vshrl.u32 %v4530_v1, %v3383_v15  ;;  %v1258_v9 = vsel %vm1248_vm8, %v1255_v29, %v1257_v43  ;;  %v1259_v57 = vsel %vm1247_vm1, %v1237_v40, %v1240_v44  ;;  %1746 = vperm.xlu1 %2861, %v1736_v30  }
 0x10a   :  { %v175_v61 = vxor.u32 2147483648, %v2871_v10  ;;  %v367_v3 = vxor.u32 2147483648, %v366_v38  ;;  %v1261_v33 = vsel %vm1249_vm11, %v3491_v16, %v3648_v12  ;;  %v1263_v46 = vshll.u32 %v1223_v42, 8 }
 0x10b   :  { %v172_v58 = vxor.u32 2147483648, %v2873_v54  ;;  %v1075_v15 = vclz %v2710_v48  ;;  %v1251_v27 = vsel %vm1247_vm1, %v1231_v50, %v1234_v14  ;;  %v1253_v18 = vsel %vm1249_vm11, %v1237_v40, %v1252_v26 }
 0x10c   :  { %v368_v59 = vsel %vm285_vm13, %v367_v3, %v366_v38  ;;  %v1262_v13 = vsel %vm1248_vm8, %v1259_v57, %v1261_v33  ;;  %v3756_v44 = vmul.u32.u64.low %v1263_v46, %v1258_v9  ;;  %v3757_v55 = vmul.u32.u64.high %v1263_v46, %v1258_v9, %v3756_v44 }
 0x10d   :  { %v371_v16 = vsel %vm3697_vm4, %v3091_v47, %v368_v59  ;;  %vm585_vm0 = vcmp.lt.s32.totalorder %v3705_v41, 2  ;;  %v2711_v12 = vadd.s32 4294967294, %v1075_v15  ;;  %vm167_vm13 = vweird.f32 %v3078_v25  ;;  %1756 = vperm.xlu1 %2861, %v1738_v52  }
 0x10e   :  { %v3764_v14 = vmul.u32.u64.low %v1263_v46, %v1262_v13  ;;  %v3765_v40 = vmul.u32.u64.high %v1263_v46, %v1262_v13, %v3764_v14  ;;  %v176_v42 = vsel %vm174_vm5, %v175_v61, %v2873_v54  ;;  %2874 = vcosq.f32 %v371_v16 }
 0x10f   :  { %v3773_v22 = vand.u32 3, %v376_v17  ;;  %v3775_v11 = vand.u32 3, %v372_v19  ;;  %v173_v29 = vsel %vm171_vm6, %v2871_v10, %v172_v58  ;;  %2876 = vsinq.f32 %v371_v16 }
 0x110   :  { %vm2712_vm14 = vcmp.lt.s32.totalorder %v2711_v12, 0  ;;  %v1254_v6 = vsel %vm1248_vm8, %v1251_v27, %v1253_v18  ;;  %v3783_v38 = vsel %vm479_vm12, nan, %v901_v39  ;;  %v1273_v43 = vadd.s32 1, %v3757_v55 }
 0x111   :  { %v1078_v26 = vsel %vm2712_vm14, 0, %v2711_v12  ;;  %v903_v17 = vand.u32 2147483647, %v3074_v23  ;;  %v591_v19 = vsel %vm589_vm7, %v175_v61, %v2873_v54  ;;  %v1063_v48 = vadd.s32 %v3622_v53, %v3636_v49  ;;  %1948 = vperm.xlu1 %2861, %v1938_v32  }
 0x112   :  { %v1079_v50 = vsub.s32 32, %v1078_v26  ;;  %v1083_v9 = vsub.s32 4294967266, %v1078_v26  ;;  %v177_v31 = vsel %vm170_vm9, %v173_v29, %v176_v42  ;;  %v588_v39 = vsel %vm586_vm10, %v2871_v10, %v172_v58  ;;  %v1940_v58 = vld [vmem:[%s4492_s5 + $0x18] sm:$0xff] }
 0x113   :  { %vm795_vm12 = vcmp.eq.s32.totalorder %v3775_v11, 2  ;;  %v1270_v57 = vmul.u32 %v1263_v46, %v1254_v6  ;;  %vm1272_vm2 = vc.u32 %v3765_v40, %v3756_v44  ;;  %vm379_vm3 = vcmp.eq.s32.totalorder %v3773_v22, 0 }
 0x114   :  { %vm792_vm4 = vcmp.eq.s32.totalorder %v3775_v11, 0  ;;  %v1080_v53 = vshll.u32 %v3714_v4, %v1078_v26  ;;  %v1081_v49 = vshrl.u32 %v1063_v48, %v1079_v50  ;;  %v1084_v54 = vadd.s32 127, %v1083_v9 }
 0x115   :  { %v1274_v45 = vsel %vm1272_vm2, %v1273_v43, %v3757_v55  ;;  %vm378_vm5 = vcmp.lt.s32.totalorder %v3773_v22, 2  ;;  %vm791_vm6 = vcmp.lt.s32.totalorder %v3775_v11, 2  ;;  %v3809_v30 = vand.u32 8388607, %v903_v17  ;;  %1958 = vperm.xlu1 %2861, %v1940_v58  }
 0x116   :  { %v1275_v10 = vadd.s32 %v1274_v45, %v1270_v57  ;;  %v921_v61 = vshrl.u32 %v4526_v51, %v3116_v7  ;;  %v927_v3 = vshrl.u32 %v4533_v36, %v3116_v7  ;;  %vm375_vm1 = vweird.f32 %v3091_v47 }
 0x117   :  { %vm382_vm11 = vcmp.eq.s32.totalorder %v3773_v22, 2  ;;  %v1082_v4 = vor.u32 %v1081_v49, %v1080_v53  ;;  %v1085_v33 = vshll.u32 %v1084_v54, 23  ;;  %v924_v46 = vshrl.u32 %v4527_v0, %v3116_v7 }
 0x118   :  { %v592_v15 = vsel %vm585_vm0, %v588_v39, %v591_v19  ;;  %v1276_v27 = vadd.s32 536870912, %v1275_v10  ;;  %v920_v18 = vshll.u32 %v4530_v1, %v3098_v60  ;;  %v926_v59 = vshll.u32 %v4527_v0, %v3098_v60  ;;  %v2875_v14 = vpop.eup %2874 }
 0x119   :  { %v178_v13 = vsel %vm167_vm13, nan, %v177_v31  ;;  %v1086_v55 = vor.u32 4788187, %v1085_v33  ;;  %v919_v16 = vshrl.u32 %v4530_v1, %v3116_v7  ;;  %v923_v12 = vshll.u32 %v4526_v51, %v3098_v60  ;;  %v2877_v6 = vpop.eup %2876  ;;  %v2750_v7 = vld [vmem:[%s4492_s5 + $0x28] sm:$0xff] }
 0x11a   :  { %v3834_v41 = vshrl.u32 %v1276_v27, 30  ;;  %v911_v52 = vor.u32 8388608, %v3809_v30  ;;  %v922_v42 = vor.u32 %v921_v61, %v920_v18  ;;  %v928_v29 = vor.u32 %v927_v3, %v926_v59  ;;  %2160 = vperm.xlu1 %2861, %v2750_v7  }
 0x11b   :  { %v383_v26 = vxor.u32 2147483648, %v2875_v14  ;;  %v1087_v43 = vand.u32 2147483647, %v1086_v55  ;;  %v1089_v19 = vcvt.s32.f32 %v1082_v4  ;;  %v925_v48 = vor.u32 %v924_v46, %v923_v12 }
 0x11c   :  { %v380_v50 = vxor.u32 2147483648, %v2877_v6  ;;  %v1278_v60 = vshll.u32 %v3834_v41, 30  ;;  %vm935_vm7 = vcmp.lt.s32.totalorder %v3111_v5, 1  ;;  %vm936_vm8 = vcmp.lt.s32.totalorder %v3111_v5, 2 }
 0x11d   :  { %v384_v9 = vsel %vm382_vm11, %v383_v26, %v2877_v6  ;;  %v797_v32 = vsel %vm795_vm12, %v383_v26, %v2877_v6  ;;  %v1090_v31 = vmul.f32 %v1089_v19, %v1087_v43  ;;  %vm937_vm9 = vcmp.lt.s32.totalorder %v3111_v5, 3  ;;  %v4544_v26 = vld [vmem:[#allocation7_spill] sm:$0xff]  ;;  %v4545_v43 = vld [vmem:[#allocation8_spill] sm:$0xff] }
 0x11e   :  { %v381_v39 = vsel %vm379_vm3, %v2875_v14, %v380_v50  ;;  %v794_v57 = vsel %vm792_vm4, %v2875_v14, %v380_v50  ;;  %v3852_v53 = vsub.s32 %v1275_v10, %v1278_v60  ;;  %v940_v49 = vsel %vm938_vm15, %v928_v29, 2102212464  ;;  %v2752_v10 = vld [vmem:[%s4492_s5 + $0x38] sm:$0xff] }
 0x11f   :  { %v385_v54 = vsel %vm378_vm5, %v381_v39, %v384_v9  ;;  %v798_v45 = vsel %vm791_vm6, %v794_v57, %v797_v32  ;;  %v947_v30 = vsel %vm935_vm7, %v925_v48, %v928_v29  ;;  %v949_v61 = vsel %vm937_vm9, %v3245_v37, %v3276_v28  ;;  %2170 = vperm.xlu1 %2861, %v2752_v10   ;;  %v2764_v60 = vld [vmem:[%s4492_s5 + $0x58] sm:$0xff] }
 0x120   :  { %v386_v3 = vsel %vm375_vm1, nan, %v385_v54  ;;  %v1281_v22 = vsub.s32 0, %v3852_v53  ;;  %v943_v11 = vsel %vm935_vm7, %v922_v42, %v925_v48  ;;  %v945_v4 = vsel %vm937_vm9, %v928_v29, %v3272_v20 }
 0x121   :  { %v2773_v33 = vpack.c.bf16 %v386_v3, %v178_v13  ;;  %v1091_v46 = vxor.u32 2147483648, %v1090_v31  ;;  %v939_v37 = vsel %vm935_vm7, %v919_v16, %v922_v42  ;;  %v941_v28 = vsel %vm937_vm9, %v925_v48, %v940_v49 }
 0x122   :  { %v799_v58 = vsel %vm375_vm1, nan, %v798_v45  ;;  %v2775_v27 = vpack.c.bf16 %v3783_v38, %v3709_v35  ;;  %v2718_v18 = vmin.u32 %v1281_v22, %v3852_v53  ;;  %v950_v59 = vsel %vm936_vm8, %v947_v30, %v949_v61  ;;  %v2762_v35 = vld [vmem:[%s4492_s5 + $0x48] sm:$0xff] }
 0x123   :  { %v1138_v20 = vshrl.u32 %v4531_v62, %v3375_v8  ;;  %v1141_v13 = vshrl.u32 %v4528_v21, %v3375_v8  ;;  %2774 = vmatpush1.bf16.msra.mxu0 %v2773_v33  ;;  %v946_v47 = vsel %vm936_vm8, %v943_v11, %v945_v4  ;;  %v951_v55 = vshll.u32 %v911_v52, 8  ;;  %2371 = vperm.xlu1 %2861, %v2762_v35  }
 0x124   :  { %v593_v38 = vsel %vm167_vm13, nan, %v592_v15  ;;  %2776 = vmatprep.subr.bf16.mxu0 %v2775_v27  ;;  %vm1009_vm15 = vcmp.lt.s32.totalorder %v3076_v24, 0  ;;  %v1283_v16 = vclz %v2718_v18  ;;  %v942_v62 = vsel %vm936_vm8, %v939_v37, %v941_v28  ;;  %v4543_v15 = vld [vmem:[#allocation5_spill] sm:$0xff] }
 0x125   :  { %vm1146_vm10 = vcmp.lt.s32.totalorder %v3318_v2, 4  ;;  %v2777_v21 = vpack.c.bf16 %v799_v58, %v593_v38  ;;  %v1092_v12 = vsel %vm1009_vm15, %v1091_v46, %v1090_v31  ;;  %v1111_v6 = vand.u32 2147483647, %v4543_v15 }
 0x126   :  { %v3905_v14 = vmul.u32.u64.low %v951_v55, %v950_v59  ;;  %v3906_v52 = vmul.u32.u64.high %v951_v55, %v950_v59, %v3905_v14  ;;  %v2719_v42 = vadd.s32 4294967294, %v1283_v16  ;;  %v1139_v5 = vor.u32 %v1138_v20, %v4544_v26 }
 0x127   :  { %v3908_v29 = vmul.u32.u64.low %v951_v55, %v946_v47  ;;  %v3909_v25 = vmul.u32.u64.high %v951_v55, %v946_v47, %v3908_v29  ;;  %v1142_v19 = vor.u32 %v1141_v13, %v4545_v43  ;;  %2778 = vmatpush1.bf16.msra.mxu0 %v2777_v21  ;;  %v4546_v48 = vand.u32 2147483647, %v3076_v24  ;;  %2381 = vperm.xlu1 %2861, %v2764_v60  }
 0x128   :  { %v1093_v50 = vsub.s32 4, %v3685_v56  ;;  %v1271_v32 = vadd.s32 %v3756_v44, %v3765_v40  ;;  %vm2720_vm13 = vcmp.lt.s32.totalorder %v2719_v42, 0  ;;  %v958_v31 = vmul.u32 %v951_v55, %v942_v62  ;;  %v4549_v44 = vld [vmem:[#allocation6_spill] sm:$0xff] }
 0x129   :  { %vm3917_vm0 = vcmp.le.f32.partialorder %v4546_v48, 0.7853982  ;;  %v1286_v39 = vsel %vm2720_vm13, 0, %v2719_v42  ;;  %vm960_vm14 = vc.u32 %v3906_v52, %v3908_v29  ;;  %v1129_v57 = vshrl.u32 %v4526_v51, %v3375_v8 }
 0x12a   :  { %v1095_v9 = vsel %vm3917_vm0, %v3076_v24, %v1092_v12  ;;  %v1132_v49 = vshrl.u32 %v4527_v0, %v3375_v8  ;;  %v1287_v54 = vsub.s32 32, %v1286_v39  ;;  %v1291_v45 = vsub.s32 4294967266, %v1286_v39 }
 0x12b   :  { %v961_v30 = vadd.s32 1, %v3909_v25  ;;  %v1118_v61 = vand.u32 8388607, %v1111_v6  ;;  %v1128_v40 = vshll.u32 %v4530_v1, %v4549_v44  ;;  %v1131_v10 = vshll.u32 %v4526_v51, %v4549_v44 }
 0x12c   :  { %v1134_v3 = vshll.u32 %v4527_v0, %v4549_v44  ;;  %v1135_v22 = vshrl.u32 %v4533_v36, %v3375_v8  ;;  %v1288_v11 = vshll.u32 %v3852_v53, %v1286_v39  ;;  %v1289_v4 = vshrl.u32 %v1271_v32, %v1287_v54 }
 0x12d   :  { %v1292_v33 = vadd.s32 127, %v1291_v45  ;;  %v962_v46 = vsel %vm960_vm14, %v961_v30, %v3909_v25  ;;  %v1130_v28 = vor.u32 %v1129_v57, %v1128_v40  ;;  %v1133_v58 = vor.u32 %v1132_v49, %v1131_v10 }
 0x12e   :  { %v963_v37 = vadd.s32 %v962_v46, %v958_v31  ;;  %v1136_v27 = vor.u32 %v1135_v22, %v1134_v3  ;;  %v1152_v18 = vsel %vm1146_vm10, %v1139_v5, 920167782  ;;  %2878 = vcosq.f32 %v1095_v9 }
 0x12f   :  { %v1290_v51 = vor.u32 %v1289_v4, %v1288_v11  ;;  %v1293_v59 = vshll.u32 %v1292_v33, 23  ;;  %v1156_v0 = vsel %vm1146_vm10, %v1142_v19, 1326507024  ;;  %v1094_v36 = vsel %vm1009_vm15, %v1093_v50, %v3685_v56 }
 0x130   :  { %2880 = vsinq.f32 %v1095_v9  ;;  %v964_v53 = vadd.s32 536870912, %v963_v37  ;;  %v1119_v13 = vor.u32 8388608, %v1118_v61  ;;  %vm1143_vm12 = vcmp.lt.s32.totalorder %v3318_v2, 1 }
 0x131   :  { %v1294_v20 = vor.u32 4788187, %v1293_v59  ;;  %vm1145_vm2 = vcmp.lt.s32.totalorder %v3318_v2, 3  ;;  %vm1144_vm3 = vcmp.lt.s32.totalorder %v3318_v2, 2  ;;  %v1151_v55 = vsel %vm1143_vm12, %v1130_v28, %v1133_v58 }
 0x132   :  { %v3958_v47 = vshrl.u32 %v964_v53, 30  ;;  %v1153_v35 = vsel %vm1145_vm2, %v1136_v27, %v1152_v18  ;;  %v1297_v56 = vcvt.s32.f32 %v1290_v51  ;;  %v1155_v16 = vsel %vm1143_vm12, %v1133_v58, %v1136_v27 }
 0x133   :  { %v1295_v38 = vand.u32 2147483647, %v1294_v20  ;;  %v1157_v62 = vsel %vm1145_vm2, %v1139_v5, %v1156_v0  ;;  %v1301_v21 = vsub.s32 4, %v3834_v41  ;;  %v1127_v14 = vshrl.u32 %v4530_v1, %v3375_v8 }
 0x134   :  { %v966_v12 = vshll.u32 %v3958_v47, 30  ;;  %v1158_v42 = vsel %vm1144_vm3, %v1155_v16, %v1157_v62  ;;  %v1148_v26 = vsel %vm1146_vm10, %v1136_v27, 2102212464  ;;  %v1154_v43 = vsel %vm1144_vm3, %v1151_v55, %v1153_v35 }
 0x135   :  { %v1298_v25 = vmul.f32 %v1297_v56, %v1295_v38  ;;  %v1159_v19 = vshll.u32 %v1119_v13, 8  ;;  %v3981_v5 = vsel %vm3917_vm0, 0, %v1094_v36  ;;  %vm1217_vm4 = vcmp.lt.s32.totalorder %v3088_v34, 0 }
 0x136   :  { %v967_v48 = vsub.s32 %v963_v37, %v966_v12  ;;  %v1147_v8 = vsel %vm1143_vm12, %v1127_v14, %v1130_v28  ;;  %v2989_v9 = vmov 0.0   ;;  %v1149_v7 = vsel %vm1145_vm2, %v1133_v58, %v1148_v26 }
 0x137   :  { %v1299_v50 = vxor.u32 2147483648, %v1298_v25  ;;  %v3986_v1 = vmul.u32.u64.low %v1159_v19, %v1158_v42  ;;  %v3987_v60 = vmul.u32.u64.high %v1159_v19, %v1158_v42, %v3986_v1  ;;  %1836 = vmatprep.mubr.f32.mxu0 %v2989_v9  ;;  %2038 = vmatprep.mubr.f32.mxu1 %v2989_v9  ;;  %v1100_v49 = vadd.s32 3, %v3981_v5 }
 0x138   :  { %v969_v32 = vsub.s32 0, %v967_v48  ;;  %v3993_v31 = vmul.u32.u64.low %v1159_v19, %v1154_v43  ;;  %v3994_v39 = vmul.u32.u64.high %v1159_v19, %v1154_v43, %v3993_v31  ;;  %v3997_v57 = vpop.eup %2878  ;;  %vm1216_vm5 = vcmp.le.f32.partialorder %v1215_v63, 0.7853982 }
 0x139   :  { %v1300_v54 = vsel %vm1217_vm4, %v1299_v50, %v1298_v25  ;;  %v1302_v45 = vsel %vm1217_vm4, %v1301_v21, %v3834_v41  ;;  %v1150_v40 = vsel %vm1144_vm3, %v1147_v8, %v1149_v7  ;;  %v1101_v63 = vand.u32 3, %v1100_v49 }
 0x13a   :  { %v4003_v30 = vpop.eup %2880  ;;  %v1303_v61 = vsel %vm1216_vm5, %v3088_v34, %v1300_v54  ;;  %v2706_v44 = vmin.u32 %v969_v32, %v967_v48  ;;  %v4008_v10 = vsel %vm1216_vm5, 0, %v1302_v45  ;;  %vm1168_vm6 = vc.u32 %v3987_v60, %v3993_v31 }
 0x13b   :  { %2882 = vcosq.f32 %v1303_v61  ;;  %v1169_v22 = vadd.s32 1, %v3994_v39  ;;  %v1166_v11 = vmul.u32 %v1159_v19, %v1150_v40  ;;  %v1107_v4 = vxor.u32 2147483648, %v3997_v57 }
 0x13c   :  { %2884 = vsinq.f32 %v1303_v61  ;;  %v971_v3 = vclz %v2706_v44  ;;  %v1308_v33 = vadd.s32 3, %v4008_v10  ;;  %v1104_v2 = vxor.u32 2147483648, %v4003_v30 }
 0x13d   :  { %v1170_v46 = vsel %vm1168_vm6, %v1169_v22, %v3994_v39  ;;  %vm1106_vm11 = vcmp.eq.s32.totalorder %v1101_v63, 2  ;;  %v959_v58 = vadd.s32 %v3908_v29, %v3906_v52  ;;  %vm1103_vm7 = vcmp.eq.s32.totalorder %v1101_v63, 0 }
 0x13e   :  { %v2707_v41 = vadd.s32 4294967294, %v971_v3  ;;  %v1171_v37 = vadd.s32 %v1170_v46, %v1166_v11  ;;  %v1108_v59 = vsel %vm1106_vm11, %v1107_v4, %v4003_v30  ;;  %v1309_v0 = vand.u32 3, %v1308_v33 }
 0x13f   :  { %v1105_v36 = vsel %vm1103_vm7, %v3997_v57, %v1104_v2  ;;  %vm1102_vm8 = vcmp.lt.s32.totalorder %v1101_v63, 2  ;;  %vm1099_vm10 = vweird.f32 %v3076_v24  ;;  %vm1307_vm13 = vweird.f32 %v3088_v34  ;;  %v1732_v24 = vld [vmem:[%s4489_s2 + $0x8] sm:$0xff] }
 0x140   :  { %vm2708_vm1 = vcmp.lt.s32.totalorder %v2707_v41, 0  ;;  %v1172_v51 = vadd.s32 536870912, %v1171_v37  ;;  %v1109_v16 = vsel %vm1102_vm8, %v1105_v36, %v1108_v59  ;;  %vm1311_vm9 = vcmp.eq.s32.totalorder %v1309_v0, 0 }
 0x141   :  { %v974_v28 = vsel %vm2708_vm1, 0, %v2707_v41  ;;  %vm1314_vm15 = vcmp.eq.s32.totalorder %v1309_v0, 2  ;;  %vm1310_vm0 = vcmp.lt.s32.totalorder %v1309_v0, 2  ;;  %v1167_v61 = vadd.s32 %v3993_v31, %v3987_v60 }
 0x142   :  { %v975_v27 = vsub.s32 32, %v974_v28  ;;  %v979_v18 = vsub.s32 4294967266, %v974_v28  ;;  %v1173_v13 = vshrl.u32 %v1172_v51, 30  ;;  %v976_v35 = vshll.u32 %v967_v48, %v974_v28 }
 0x143   :  { %v1110_v48 = vsel %vm1099_vm10, nan, %v1109_v16  ;;  %vm905_vm12 = vcmp.lt.s32.totalorder %v3074_v23, 0  ;;  %vm904_vm2 = vcmp.le.f32.partialorder %v903_v17, 0.7853982  ;;  %vm1113_vm3 = vcmp.lt.s32.totalorder %v4543_v15, 0 }
 0x144   :  { %v977_v53 = vshrl.u32 %v959_v58, %v975_v27  ;;  %v980_v20 = vadd.s32 127, %v979_v18  ;;  %v1174_v56 = vshll.u32 %v1173_v13, 30  ;;  %v1197_v18 = vsub.s32 4, %v1173_v13 }
 0x145   :  { %v4025_v55 = vpop.eup %2882  ;;  %vm1112_vm4 = vcmp.le.f32.partialorder %v1111_v6, 0.7853982  ;;  %vm995_vm1 = vweird.f32 %v3074_v23 }
 0x146   :  { %v4027_v52 = vpop.eup %2884  ;;  %v1315_v29 = vxor.u32 2147483648, %v4025_v55  ;;  %v981_v38 = vshll.u32 %v980_v20, 23  ;;  %v978_v12 = vor.u32 %v977_v53, %v976_v35  ;;  %v1175_v42 = vsub.s32 %v1171_v37, %v1174_v56 }
 0x147   :  { %v1312_v62 = vxor.u32 2147483648, %v4027_v52  ;;  %v989_v37 = vsub.s32 4, %v3958_v47  ;;  %v1198_v0 = vsel %vm1113_vm3, %v1197_v18, %v1173_v13  ;;  %v1515_v20 = vand.u32 3, %v3981_v5 }
 0x148   :  { %v1316_v21 = vsel %vm1314_vm15, %v1315_v29, %v4027_v52  ;;  %v982_v14 = vor.u32 4788187, %v981_v38  ;;  %v1177_v19 = vsub.s32 0, %v1175_v42  ;;  %v985_v1 = vcvt.s32.f32 %v978_v12 }
 0x149   :  { %v1313_v25 = vsel %vm1311_vm9, %v4025_v55, %v1312_v62  ;;  %v990_v58 = vsel %vm905_vm12, %v989_v37, %v3958_v47  ;;  %v1200_v35 = vsel %vm1112_vm4, 0, %v1198_v0  ;;  %v1721_v56 = vand.u32 3, %v4008_v10 }
 0x14a   :  { %v1317_v26 = vsel %vm1310_vm0, %v1313_v25, %v1316_v21  ;;  %v983_v43 = vand.u32 2147483647, %v982_v14  ;;  %v2714_v32 = vmin.u32 %v1177_v19, %v1175_v42  ;;  %v992_v59 = vsel %vm904_vm2, 0, %v990_v58 }
 0x14b   :  { %v1318_v50 = vsel %vm1307_vm13, nan, %v1317_v26  ;;  %v996_v53 = vadd.s32 3, %v992_v59  ;;  %v1204_v21 = vadd.s32 3, %v1200_v35  ;;  %vm1517_vm5 = vcmp.eq.s32.totalorder %v1515_v20, 0 }
 0x14c   :  { %v2779_v8 = vpack.c.bf16 %v1318_v50, %v1110_v48  ;;  %v986_v7 = vmul.f32 %v985_v1, %v983_v43  ;;  %v1179_v39 = vclz %v2714_v32  ;;  %v1519_v6 = vsel %vm1517_vm5, %v3997_v57, %v1104_v2 }
 0x14d   :  { %v997_v16 = vand.u32 3, %v996_v53  ;;  %vm1520_vm6 = vcmp.eq.s32.totalorder %v1515_v20, 2  ;;  %v1412_v14 = vand.u32 3, %v992_v59  ;;  %vm1516_vm11 = vcmp.lt.s32.totalorder %v1515_v20, 2  ;;  %v1752_v20 = vpop.permute.xlu0 %1751 }
 0x14e   :  { %2780 = vmatprep.subr.bf16.mxu0 %v2779_v8  ;;  %v2715_v49 = vadd.s32 4294967294, %v1179_v39  ;;  %v987_v54 = vxor.u32 2147483648, %v986_v7  ;;  %v1522_v5 = vsel %vm1520_vm6, %v1107_v4, %v4003_v30  ;;  %vm1723_vm7 = vcmp.eq.s32.totalorder %v1721_v56, 0 }
 0x14f   :  { %vm1726_vm8 = vcmp.eq.s32.totalorder %v1721_v56, 2  ;;  %v1618_v10 = vand.u32 3, %v1200_v35  ;;  %vm998_vm9 = vcmp.lt.s32.totalorder %v997_v16, 2  ;;  %v1725_v2 = vsel %vm1723_vm7, %v4025_v55, %v1312_v62 }
 0x150   :  { %vm2716_vm14 = vcmp.lt.s32.totalorder %v2715_v49, 0  ;;  %v988_v3 = vsel %vm905_vm12, %v987_v54, %v986_v7  ;;  %v1728_v25 = vsel %vm1726_vm8, %v1315_v29, %v4027_v52  ;;  %vm999_vm15 = vcmp.eq.s32.totalorder %v997_v16, 0 }
 0x151   :  { %v1182_v45 = vsel %vm2716_vm14, 0, %v2715_v49  ;;  %v991_v46 = vsel %vm904_vm2, %v3074_v23, %v988_v3  ;;  %vm1002_vm0 = vcmp.eq.s32.totalorder %v997_v16, 2  ;;  %v1523_v57 = vsel %vm1516_vm11, %v1519_v6, %v1522_v5  ;;  %v1733_v23 = vld [vmem:[%s4489_s2 + $0x10] sm:$0xff] }
 0x152   :  { %v1183_v44 = vsub.s32 32, %v1182_v45  ;;  %v1187_v40 = vsub.s32 4294967266, %v1182_v45  ;;  %v1184_v63 = vshll.u32 %v1175_v42, %v1182_v45  ;;  %2886 = vcosq.f32 %v991_v46 }
 0x153   :  { %2888 = vsinq.f32 %v991_v46  ;;  %v1205_v42 = vand.u32 3, %v1204_v21  ;;  %vm1722_vm14 = vcmp.lt.s32.totalorder %v1721_v56, 2  ;;  %vm1414_vm12 = vcmp.eq.s32.totalorder %v1412_v14, 0 }
 0x154   :  { %v1185_v22 = vshrl.u32 %v1167_v61, %v1183_v44  ;;  %v1188_v41 = vadd.s32 127, %v1187_v40  ;;  %vm1417_vm2 = vcmp.eq.s32.totalorder %v1412_v14, 2  ;;  %v1729_v48 = vsel %vm1722_vm14, %v1725_v2, %v1728_v25 }
 0x155   :  { %vm1206_vm5 = vcmp.lt.s32.totalorder %v1205_v42, 2  ;;  %vm1210_vm6 = vcmp.eq.s32.totalorder %v1205_v42, 2  ;;  %vm1623_vm7 = vcmp.eq.s32.totalorder %v1618_v10, 2  ;;  %vm1207_vm8 = vcmp.eq.s32.totalorder %v1205_v42, 0 }
 0x156   :  { %v1186_v11 = vor.u32 %v1185_v22, %v1184_v63  ;;  %v1189_v33 = vshll.u32 %v1188_v41, 23  ;;  %vm1203_vm11 = vweird.f32 %v4543_v15  ;;  %v1730_v39 = vsel %vm1307_vm13, nan, %v1729_v48  ;;  %v1731_v22 = vld [vmem:[%s4489_s2] sm:$0xff]  ;;  %v1734_v41 = vld [vmem:[%s4489_s2 + $0x18] sm:$0xff] }
 0x157   :  { %v1524_v44 = vsel %vm1099_vm10, nan, %v1523_v57  ;;  %vm1759_vm13 = vcmask 523264   ;;  %vm1961_vm10 = vcmask 261120  }
 0x158   :  { %v1190_v28 = vor.u32 4788187, %v1189_v33  ;;  %v1193_v31 = vcvt.s32.f32 %v1186_v11  ;;  %v2783_v3 = vpack.c.bf16 %v1730_v39, %v1524_v44 }
 0x15a   :  { %v1191_v60 = vand.u32 2147483647, %v1190_v28 }
 0x15c   :  { %v1194_v27 = vmul.f32 %v1193_v31, %v1191_v60  ;;  %v2887_v47 = vpop.eup %2886 }
 0x15d   :  { %v2889_v38 = vpop.eup %2888  ;;  %v1003_v12 = vxor.u32 2147483648, %v2887_v47 }
 0x15e   :  { %v1195_v51 = vxor.u32 2147483648, %v1194_v27  ;;  %v1000_v13 = vxor.u32 2147483648, %v2889_v38 }
 0x15f   :  { %v1004_v26 = vsel %vm1002_vm0, %v1003_v12, %v2889_v38  ;;  %v1419_v1 = vsel %vm1417_vm2, %v1003_v12, %v2889_v38 }
 0x160   :  { %v1196_v17 = vsel %vm1113_vm3, %v1195_v51, %v1194_v27  ;;  %v1001_v4 = vsel %vm999_vm15, %v2887_v47, %v1000_v13  ;;  %vm1619_vm3 = vcmp.lt.s32.totalorder %v1618_v10, 2  ;;  %v1416_v8 = vsel %vm1414_vm12, %v2887_v47, %v1000_v13 }
 0x161   :  { %v1199_v36 = vsel %vm1112_vm4, %v4543_v15, %v1196_v17  ;;  %vm1620_vm4 = vcmp.eq.s32.totalorder %v1618_v10, 0  ;;  %v1005_v55 = vsel %vm998_vm9, %v1001_v4, %v1004_v26  ;;  %vm1413_vm9 = vcmp.lt.s32.totalorder %v1412_v14, 2 }
 0x162   :  { %2890 = vcosq.f32 %v1199_v36  ;;  %v1006_v54 = vsel %vm995_vm1, nan, %v1005_v55  ;;  %v1420_v40 = vsel %vm1413_vm9, %v1416_v8, %v1419_v1 }
 0x163   :  { %2892 = vsinq.f32 %v1199_v36  ;;  %v1421_v34 = vsel %vm995_vm1, nan, %v1420_v40 }
 0x16c   :  { %v2891_v30 = vpop.eup %2890 }
 0x16d   :  { %v2893_v43 = vpop.eup %2892  ;;  %v1211_v19 = vxor.u32 2147483648, %v2891_v30 }
 0x16e   :  { %v1208_v62 = vxor.u32 2147483648, %v2893_v43 }
 0x16f   :  { %v1212_v52 = vsel %vm1210_vm6, %v1211_v19, %v2893_v43  ;;  %v1625_v29 = vsel %vm1623_vm7, %v1211_v19, %v2893_v43 }
 0x170   :  { %v1209_v50 = vsel %vm1207_vm8, %v2891_v30, %v1208_v62  ;;  %v1622_v32 = vsel %vm1620_vm4, %v2891_v30, %v1208_v62 }
 0x171   :  { %v1213_v7 = vsel %vm1206_vm5, %v1209_v50, %v1212_v52  ;;  %v1626_v49 = vsel %vm1619_vm3, %v1622_v32, %v1625_v29 }
 0x172   :  { %v1214_v45 = vsel %vm1203_vm11, nan, %v1213_v7  ;;  %v1627_v63 = vsel %vm1203_vm11, nan, %v1626_v49 }
 0x173   :  { %v2781_v61 = vpack.c.bf16 %v1214_v45, %v1006_v54  ;;  %v2785_v15 = vpack.c.bf16 %v1627_v63, %v1421_v34 }
 0x175   :  { %2782 = vmatpush1.bf16.msra.mxu0 %v2781_v61 }
 0x176   :  { %2784 = vmatprep.subr.bf16.mxu0 %v2783_v3 }
 0x179   :  { %2786 = vmatpush1.bf16.msra.mxu0 %v2785_v15 }
 0x17c   :  { %2737 = vmatmul.mubr.msk.f32.vlgmr.msra.gmra.mrb[0].mxu0 %vm1759_vm13, %v1731_v22 }
 0x17d   :  { %1842 = vmatprep.mubr.f32.mxu0 %v2989_v9 }
 0x180   :  { %2738 = vmatmul.mubr.msk.f32.gmra.mrb[2].mxu0 %vm1759_vm13, %v1732_v24 }
 0x181   :  { %1848 = vmatprep.mubr.f32.mxu0 %v2989_v9 }
 0x183   :  { %v1742_v11 = vpop.permute.xlu1 %1741 }
 0x184   :  { %2739 = vmatmul.mubr.msk.f32.gmra.mrb[4].mxu0 %vm1759_vm13, %v1733_v23 }
 0x185   :  { %1854 = vmatprep.mubr.f32.mxu0 %v2989_v9 }
 0x188   :  { %2740 = vmatmul.mubr.msk.f32.gmra.mrb[6].mxu0 %vm1759_vm13, %v1734_v41  ;;  %v1747_v31 = vpop.permute.xlu1 %1746 }
 0x189   :  { %2460 = vmatprep.mubr.f32.mxu0 %v2989_v9 }
 0x18c   :  { %v1757_v2 = vpop.permute.xlu1 %1756 }
 0x24f   :  { %v1838_v33 = vpop.f32.mrb[0].mxu0 }
 0x250   :  { %v4099_v46 = vadd.f32 %v1838_v33, %v1742_v11  ;;  %v1840_v37 = vpop.f32.mrb[1].mxu0 }
 0x251   :  { %v4101_v28 = vadd.f32 %v1840_v37, %v1742_v11 }
 0x252   :  { %v1861_v60 = vmul.f32 %v4099_v46, %v4099_v46 }
 0x253   :  { %v1862_v58 = vmul.f32 %v4101_v28, %v4101_v28  ;;  %v1844_v27 = vpop.f32.mrb[2].mxu0 }
 0x254   :  { %v1869_v18 = vmul.f32 %v1861_v60, %v4099_v46  ;;  %v4108_v51 = vadd.f32 %v1844_v27, %v1747_v31  ;;  %v1846_v59 = vpop.f32.mrb[3].mxu0 }
 0x255   :  { %v1870_v17 = vmul.f32 %v1862_v58, %v4101_v28  ;;  %v4111_v0 = vadd.f32 %v1846_v59, %v1747_v31 }
 0x256   :  { %v1877_v36 = vmul.f32 0.044715, %v1869_v18  ;;  %v1863_v53 = vmul.f32 %v4108_v51, %v4108_v51 }
 0x257   :  { %v1878_v35 = vmul.f32 0.044715, %v1870_v17  ;;  %v1864_v47 = vmul.f32 %v4111_v0, %v4111_v0  ;;  %v1850_v38 = vpop.f32.mrb[4].mxu0 }
 0x258   :  { %v1885_v56 = vadd.f32 %v1877_v36, %v4099_v46  ;;  %v1871_v16 = vmul.f32 %v1863_v53, %v4108_v51  ;;  %v4119_v21 = vadd.f32 %v1850_v38, %v1752_v20  ;;  %v1852_v6 = vpop.f32.mrb[5].mxu0 }
 0x259   :  { %v1872_v13 = vmul.f32 %v1864_v47, %v4111_v0  ;;  %v4122_v12 = vadd.f32 %v1852_v6, %v1752_v20  ;;  %v1886_v5 = vadd.f32 %v1878_v35, %v4101_v28 }
 0x25a   :  { %v1893_v14 = vmul.f32 0.7978846, %v1885_v56  ;;  %v1879_v10 = vmul.f32 0.044715, %v1871_v16  ;;  %v1865_v42 = vmul.f32 %v4119_v21, %v4119_v21 }
 0x25b   :  { %v1880_v25 = vmul.f32 0.044715, %v1872_v13  ;;  %v1866_v57 = vmul.f32 %v4122_v12, %v4122_v12  ;;  %v1856_v30 = vpop.f32.mrb[6].mxu0  ;;  %v1894_v4 = vmul.f32 0.7978846, %v1886_v5 }
 0x25c   :  { %v1887_v26 = vadd.f32 %v1879_v10, %v4108_v51  ;;  %v1873_v43 = vmul.f32 %v1865_v42, %v4119_v21  ;;  %v4131_v19 = vadd.f32 %v1856_v30, %v1757_v2  ;;  %v1858_v48 = vpop.f32.mrb[7].mxu0  ;;  %2894 = vtanh.f32 %v1893_v14 }
 0x25d   :  { %v1874_v62 = vmul.f32 %v1866_v57, %v4122_v12  ;;  %v1859_v55 = vadd.f32 %v1858_v48, %v1757_v2  ;;  %v1888_v52 = vadd.f32 %v1880_v25, %v4111_v0  ;;  %2896 = vtanh.f32 %v1894_v4 }
 0x25e   :  { %v1895_v29 = vmul.f32 0.7978846, %v1887_v26  ;;  %v1881_v50 = vmul.f32 0.044715, %v1873_v43  ;;  %v1867_v8 = vmul.f32 %v4131_v19, %v4131_v19  ;;  %v1933_v26 = vld [vmem:[%s4491_s4] sm:$0xff]  ;;  %v1936_v43 = vld [vmem:[%s4491_s4 + $0x18] sm:$0xff] }
 0x25f   :  { %v1882_v1 = vmul.f32 0.044715, %v1874_v62  ;;  %v1868_v32 = vmul.f32 %v1859_v55, %v1859_v55  ;;  %v1896_v7 = vmul.f32 0.7978846, %v1888_v52 }
 0x260   :  { %v1889_v39 = vadd.f32 %v1881_v50, %v4119_v21  ;;  %v1875_v49 = vmul.f32 %v1867_v8, %v4131_v19  ;;  %2898 = vtanh.f32 %v1895_v29  ;;  %v1949_v50 = vpop.permute.xlu1 %1948 }
 0x261   :  { %v1890_v54 = vadd.f32 %v1882_v1, %v4122_v12  ;;  %v1876_v45 = vmul.f32 %v1868_v32, %v1859_v55  ;;  %2900 = vtanh.f32 %v1896_v7 }
 0x262   :  { %v1897_v61 = vmul.f32 0.7978846, %v1889_v39  ;;  %v1883_v44 = vmul.f32 0.044715, %v1875_v49 }
 0x263   :  { %v1898_v40 = vmul.f32 0.7978846, %v1890_v54  ;;  %v1884_v3 = vmul.f32 0.044715, %v1876_v45 }
 0x264   :  { %2902 = vtanh.f32 %v1897_v61  ;;  %v1891_v63 = vadd.f32 %v1883_v44, %v4131_v19 }
 0x265   :  { %2904 = vtanh.f32 %v1898_v40  ;;  %v1892_v34 = vadd.f32 %v1884_v3, %v1859_v55 }
 0x266   :  { %v2895_v15 = vpop.eup %2894  ;;  %v1899_v22 = vmul.f32 0.7978846, %v1891_v63 }
 0x267   :  { %v2897_v24 = vpop.eup %2896  ;;  %v1900_v23 = vmul.f32 0.7978846, %v1892_v34  ;;  %v1909_v11 = vadd.f32 1.0, %v2895_v15 }
 0x268   :  { %2906 = vtanh.f32 %v1899_v22  ;;  %v1910_v41 = vadd.f32 1.0, %v2897_v24 }
 0x269   :  { %2908 = vtanh.f32 %v1900_v23  ;;  %v1917_v27 = vmul.f32 0.5, %v1909_v11 }
 0x26a   :  { %v2899_v33 = vpop.eup %2898  ;;  %v1918_v58 = vmul.f32 0.5, %v1910_v41 }
 0x26b   :  { %v2901_v37 = vpop.eup %2900  ;;  %v1911_v60 = vadd.f32 1.0, %v2899_v33  ;;  %v4151_v38 = vmul.f32 %v1917_v27, %v4099_v46 }
 0x26c   :  { %v1912_v31 = vadd.f32 1.0, %v2901_v37  ;;  %v4145_v20 = vmul.f32 %v1918_v58, %v4101_v28 }
 0x26d   :  { %v1919_v18 = vmul.f32 0.5, %v1911_v60 }
 0x26e   :  { %v2903_v59 = vpop.eup %2902  ;;  %v1920_v17 = vmul.f32 0.5, %v1912_v31  ;;  %v1959_v31 = vpop.permute.xlu1 %1958 }
 0x26f   :  { %v2905_v36 = vpop.eup %2904  ;;  %v4142_v53 = vmul.f32 %v1919_v18, %v4108_v51  ;;  %v1913_v56 = vadd.f32 1.0, %v2903_v59 }
 0x270   :  { %v4148_v35 = vmul.f32 %v1920_v17, %v4111_v0  ;;  %v1914_v47 = vadd.f32 1.0, %v2905_v36 }
 0x271   :  { %v2789_v51 = vpack.c.bf16 %v4142_v53, %v4151_v38  ;;  %v1921_v0 = vmul.f32 0.5, %v1913_v56 }
 0x272   :  { %v2907_v16 = vpop.eup %2906  ;;  %v2787_v6 = vpack.c.bf16 %v4148_v35, %v4145_v20  ;;  %v1922_v14 = vmul.f32 0.5, %v1914_v47 }
 0x273   :  { %v2909_v13 = vpop.eup %2908  ;;  %v1915_v5 = vadd.f32 1.0, %v2907_v16  ;;  %v4166_v57 = vmul.f32 %v1921_v0, %v4119_v21  ;;  %v1934_v21 = vld [vmem:[%s4491_s4 + $0x8] sm:$0xff] }
 0x274   :  { %2788 = vmatprep.subr.bf16.mxu1 %v2787_v6  ;;  %v1916_v28 = vadd.f32 1.0, %v2909_v13  ;;  %v4161_v2 = vmul.f32 %v1922_v14, %v4122_v12  ;;  %v1935_v12 = vld [vmem:[%s4491_s4 + $0x10] sm:$0xff] }
 0x275   :  { %2790 = vmatpush1.bf16.msra.mxu1 %v2789_v51  ;;  %v1923_v10 = vmul.f32 0.5, %v1915_v5 }
 0x276   :  { %v1924_v42 = vmul.f32 0.5, %v1916_v28 }
 0x277   :  { %v4158_v46 = vmul.f32 %v1923_v10, %v4131_v19  ;;  %v1944_v19 = vpop.permute.xlu0 %1943 }
 0x278   :  { %v4163_v25 = vmul.f32 %v1924_v42, %v1859_v55 }
 0x279   :  { %v2793_v4 = vpack.c.bf16 %v4158_v46, %v4166_v57 }
 0x27a   :  { %v2791_v30 = vpack.c.bf16 %v4163_v25, %v4161_v2 }
 0x27b   :  { %v1954_v44 = vpop.permute.xlu0 %1953 }
 0x27c   :  { %2792 = vmatprep.subr.bf16.mxu1 %v2791_v30 }
 0x27d   :  { %2794 = vmatpush1.bf16.msra.mxu1 %v2793_v4 }
 0x280   :  { %2741 = vmatmul.mubr.msk.f32.vlgmr.msra.gmra.mrb[0].mxu1 %vm1961_vm10, %v1933_v26 }
 0x281   :  { %2044 = vmatprep.mubr.f32.mxu1 %v2989_v9 }
 0x284   :  { %2742 = vmatmul.mubr.msk.f32.gmra.mrb[2].mxu1 %vm1961_vm10, %v1934_v21 }
 0x285   :  { %2050 = vmatprep.mubr.f32.mxu1 %v2989_v9 }
 0x288   :  { %2743 = vmatmul.mubr.msk.f32.gmra.mrb[4].mxu1 %vm1961_vm10, %v1935_v12 }
 0x289   :  { %2056 = vmatprep.mubr.f32.mxu1 %v2989_v9 }
 0x28c   :  { %2744 = vmatmul.mubr.msk.f32.gmra.mrb[6].mxu1 %vm1961_vm10, %v1936_v43 }
 0x28d   :  { %2249 = vmatprep.mubr.f32.mxu1 %v2989_v9 }
 0x353   :  { %v2040_v48 = vpop.f32.mrb[0].mxu1 }
 0x354   :  { %v4192_v62 = vadd.f32 %v2040_v48, %v1944_v19  ;;  %v2042_v55 = vpop.f32.mrb[1].mxu1 }
 0x355   :  { %v4194_v52 = vadd.f32 %v2042_v55, %v1944_v19 }
 0x356   :  { %v2063_v29 = vmul.f32 %v4192_v62, %v4192_v62 }
 0x357   :  { %v2064_v8 = vmul.f32 %v4194_v52, %v4194_v52  ;;  %v2046_v1 = vpop.f32.mrb[2].mxu1 }
 0x358   :  { %v2071_v32 = vmul.f32 %v2063_v29, %v4192_v62  ;;  %v4201_v7 = vadd.f32 %v2046_v1, %v1949_v50  ;;  %v2048_v39 = vpop.f32.mrb[3].mxu1 }
 0x359   :  { %v2072_v49 = vmul.f32 %v2064_v8, %v4194_v52  ;;  %v4204_v54 = vadd.f32 %v2048_v39, %v1949_v50 }
 0x35a   :  { %v2079_v45 = vmul.f32 0.044715, %v2071_v32  ;;  %v2065_v61 = vmul.f32 %v4201_v7, %v4201_v7 }
 0x35b   :  { %v2080_v40 = vmul.f32 0.044715, %v2072_v49  ;;  %v2066_v3 = vmul.f32 %v4204_v54, %v4204_v54  ;;  %v2052_v63 = vpop.f32.mrb[4].mxu1 }
 0x35c   :  { %v2087_v34 = vadd.f32 %v2079_v45, %v4192_v62  ;;  %v2073_v15 = vmul.f32 %v2065_v61, %v4201_v7  ;;  %v4212_v22 = vadd.f32 %v2052_v63, %v1954_v44  ;;  %v2054_v24 = vpop.f32.mrb[5].mxu1 }
 0x35d   :  { %v2088_v23 = vadd.f32 %v2080_v40, %v4194_v52  ;;  %v2074_v41 = vmul.f32 %v2066_v3, %v4204_v54  ;;  %v4216_v11 = vadd.f32 %v2054_v24, %v1954_v44 }
 0x35e   :  { %v2095_v33 = vmul.f32 0.7978846, %v2087_v34  ;;  %v2081_v37 = vmul.f32 0.044715, %v2073_v15  ;;  %v2067_v60 = vmul.f32 %v4212_v22, %v4212_v22 }
 0x35f   :  { %v2096_v58 = vmul.f32 0.7978846, %v2088_v23  ;;  %v2082_v27 = vmul.f32 0.044715, %v2074_v41  ;;  %v2068_v18 = vmul.f32 %v4216_v11, %v4216_v11  ;;  %v2058_v59 = vpop.f32.mrb[6].mxu1 }
 0x360   :  { %2910 = vtanh.f32 %v2095_v33  ;;  %v2089_v17 = vadd.f32 %v2081_v37, %v4201_v7  ;;  %v2075_v36 = vmul.f32 %v2067_v60, %v4212_v22  ;;  %v4224_v47 = vadd.f32 %v2058_v59, %v1959_v31  ;;  %v2060_v56 = vpop.f32.mrb[7].mxu1 }
 0x361   :  { %2912 = vtanh.f32 %v2096_v58  ;;  %v2090_v16 = vadd.f32 %v2082_v27, %v4204_v54  ;;  %v2076_v6 = vmul.f32 %v2068_v18, %v4216_v11  ;;  %v4228_v13 = vadd.f32 %v2060_v56, %v1959_v31 }
 0x362   :  { %v2097_v51 = vmul.f32 0.7978846, %v2089_v17  ;;  %v2083_v5 = vmul.f32 0.044715, %v2075_v36  ;;  %v2069_v28 = vmul.f32 %v4224_v47, %v4224_v47 }
 0x363   :  { %v2098_v14 = vmul.f32 0.7978846, %v2090_v16  ;;  %v2084_v0 = vmul.f32 0.044715, %v2076_v6  ;;  %v2070_v10 = vmul.f32 %v4228_v13, %v4228_v13 }
 0x364   :  { %2914 = vtanh.f32 %v2097_v51  ;;  %v2091_v42 = vadd.f32 %v2083_v5, %v4212_v22  ;;  %v2077_v30 = vmul.f32 %v2069_v28, %v4224_v47 }
 0x365   :  { %2916 = vtanh.f32 %v2098_v14  ;;  %v2092_v4 = vadd.f32 %v2084_v0, %v4216_v11  ;;  %v2078_v26 = vmul.f32 %v2070_v10, %v4228_v13 }
 0x366   :  { %v2099_v21 = vmul.f32 0.7978846, %v2091_v42  ;;  %v2085_v12 = vmul.f32 0.044715, %v2077_v30 }
 0x367   :  { %v2100_v43 = vmul.f32 0.7978846, %v2092_v4  ;;  %v2086_v19 = vmul.f32 0.044715, %v2078_v26  ;;  %v2161_v26 = vpop.permute.xlu1 %2160 }
 0x368   :  { %2918 = vtanh.f32 %v2099_v21  ;;  %v2093_v48 = vadd.f32 %v2085_v12, %v4224_v47 }
 0x369   :  { %2920 = vtanh.f32 %v2100_v43  ;;  %v2094_v55 = vadd.f32 %v2086_v19, %v4228_v13 }
 0x36a   :  { %v2911_v29 = vpop.eup %2910  ;;  %v2101_v50 = vmul.f32 0.7978846, %v2093_v48 }
 0x36b   :  { %v2913_v8 = vpop.eup %2912  ;;  %v2111_v1 = vadd.f32 1.0, %v2911_v29  ;;  %v2102_v32 = vmul.f32 0.7978846, %v2094_v55 }
 0x36c   :  { %2922 = vtanh.f32 %v2101_v50  ;;  %v2112_v39 = vadd.f32 1.0, %v2913_v8 }
 0x36d   :  { %2924 = vtanh.f32 %v2102_v32  ;;  %v2119_v44 = vmul.f32 0.5, %v2111_v1 }
 0x36e   :  { %v2915_v49 = vpop.eup %2914  ;;  %v2120_v45 = vmul.f32 0.5, %v2112_v39 }
 0x36f   :  { %v2917_v61 = vpop.eup %2916  ;;  %v2113_v40 = vadd.f32 1.0, %v2915_v49  ;;  %v2127_v41 = vmul.f32 %v2119_v44, %v4192_v62 }
 0x370   :  { %v2114_v3 = vadd.f32 1.0, %v2917_v61  ;;  %v2128_v24 = vmul.f32 %v2120_v45, %v4194_v52 }
 0x371   :  { %v2121_v63 = vmul.f32 0.5, %v2113_v40 }
 0x372   :  { %v2919_v34 = vpop.eup %2918  ;;  %v2122_v15 = vmul.f32 0.5, %v2114_v3  ;;  %v4248_v18 = vadd.f32 %v2128_v24, %v4145_v20 }
 0x373   :  { %v2921_v23 = vpop.eup %2920  ;;  %v2129_v33 = vmul.f32 %v2121_v63, %v4201_v7  ;;  %v2115_v37 = vadd.f32 1.0, %v2919_v34  ;;  %v4254_v7 = vadd.f32 %v2127_v41, %v4151_v38  ;;  %v2171_v41 = vpop.permute.xlu1 %2170 }
 0x374   :  { %v2130_v60 = vmul.f32 %v2122_v15, %v4204_v54  ;;  %v2116_v31 = vadd.f32 1.0, %v2921_v23 }
 0x375   :  { %v4245_v58 = vadd.f32 %v2129_v33, %v4142_v53  ;;  %v2123_v36 = vmul.f32 0.5, %v2115_v37 }
 0x376   :  { %v2923_v27 = vpop.eup %2922  ;;  %v4251_v59 = vadd.f32 %v2130_v60, %v4148_v35  ;;  %v2124_v52 = vmul.f32 0.5, %v2116_v31 }
 0x377   :  { %v2925_v17 = vpop.eup %2924  ;;  %v2117_v62 = vadd.f32 1.0, %v2923_v27  ;;  %v2797_v16 = vpack.c.bf16 %v4245_v58, %v4254_v7  ;;  %v2131_v6 = vmul.f32 %v2123_v36, %v4212_v22 }
 0x378   :  { %v2795_v54 = vpack.c.bf16 %v4251_v59, %v4248_v18  ;;  %v2118_v56 = vadd.f32 1.0, %v2925_v17  ;;  %v2132_v35 = vmul.f32 %v2124_v52, %v4216_v11 }
 0x379   :  { %v2125_v53 = vmul.f32 0.5, %v2117_v62  ;;  %v4274_v0 = vadd.f32 %v2131_v6, %v4166_v57  ;;  %v2748_v57 = vld [vmem:[%s4491_s4 + $0x38] sm:$0xff] }
 0x37a   :  { %2796 = vmatprep.subr.bf16.mxu1 %v2795_v54  ;;  %v2126_v20 = vmul.f32 0.5, %v2118_v56  ;;  %v4268_v28 = vadd.f32 %v2132_v35, %v4161_v2  ;;  %v2746_v2 = vld [vmem:[%s4491_s4 + $0x28] sm:$0xff] }
 0x37b   :  { %v2133_v51 = vmul.f32 %v2125_v53, %v4224_v47  ;;  %2798 = vmatpush1.bf16.msra.mxu1 %v2797_v16  ;;  %v2156_v47 = vpop.permute.xlu0 %2155 }
 0x37c   :  { %v2134_v38 = vmul.f32 %v2126_v20, %v4228_v13 }
 0x37d   :  { %v4265_v5 = vadd.f32 %v2133_v51, %v4158_v46  ;;  %v2745_v46 = vld [vmem:[%s4491_s4 + $0x20] sm:$0xff] }
 0x37e   :  { %v4271_v14 = vadd.f32 %v2134_v38, %v4163_v25  ;;  %v2747_v25 = vld [vmem:[%s4491_s4 + $0x30] sm:$0xff] }
 0x37f   :  { %v2801_v11 = vpack.c.bf16 %v4265_v5, %v4274_v0  ;;  %v2166_v1 = vpop.permute.xlu0 %2165 }
 0x380   :  { %v2799_v22 = vpack.c.bf16 %v4271_v14, %v4268_v28 }
 0x382   :  { %2800 = vmatprep.subr.bf16.mxu1 %v2799_v22 }
 0x383   :  { %2802 = vmatpush1.bf16.msra.mxu1 %v2801_v11 }
 0x386   :  { %2753 = vmatmul.mubr.msk.f32.vlgmr.msra.gmra.mrb[8].mxu1 %vm1961_vm10, %v2745_v46 }
 0x387   :  { %2255 = vmatprep.mubr.f32.mxu1 %v2989_v9 }
 0x38a   :  { %2754 = vmatmul.mubr.msk.f32.gmra.mrb[10].mxu1 %vm1961_vm10, %v2746_v2 }
 0x38b   :  { %2261 = vmatprep.mubr.f32.mxu1 %v2989_v9 }
 0x38e   :  { %2755 = vmatmul.mubr.msk.f32.gmra.mrb[12].mxu1 %vm1961_vm10, %v2747_v25 }
 0x38f   :  { %2267 = vmatprep.mubr.f32.mxu1 %v2989_v9 }
 0x392   :  { %2756 = vmatmul.mubr.msk.f32.gmra.mrb[14].mxu1 %vm1961_vm10, %v2748_v57 }
 0x393   :  { %2639 = vmatprep.mubr.f32.mxu1 %v2989_v9 }
 0x459   :  { %v2251_v13 = vpop.f32.mrb[8].mxu1 }
 0x45a   :  { %v4300_v10 = vadd.f32 %v2251_v13, %v2156_v47  ;;  %v2253_v42 = vpop.f32.mrb[9].mxu1 }
 0x45b   :  { %v4302_v30 = vadd.f32 %v2253_v42, %v2156_v47 }
 0x45c   :  { %v2274_v4 = vmul.f32 %v4300_v10, %v4300_v10 }
 0x45d   :  { %v2275_v21 = vmul.f32 %v4302_v30, %v4302_v30  ;;  %v2257_v12 = vpop.f32.mrb[10].mxu1 }
 0x45e   :  { %v2282_v43 = vmul.f32 %v2274_v4, %v4300_v10  ;;  %v4309_v19 = vadd.f32 %v2257_v12, %v2161_v26  ;;  %v2259_v48 = vpop.f32.mrb[11].mxu1 }
 0x45f   :  { %v2283_v55 = vmul.f32 %v2275_v21, %v4302_v30  ;;  %v4312_v29 = vadd.f32 %v2259_v48, %v2161_v26 }
 0x460   :  { %v2290_v50 = vmul.f32 0.044715, %v2282_v43  ;;  %v2276_v8 = vmul.f32 %v4309_v19, %v4309_v19 }
 0x461   :  { %v2291_v32 = vmul.f32 0.044715, %v2283_v55  ;;  %v2277_v39 = vmul.f32 %v4312_v29, %v4312_v29  ;;  %v2263_v49 = vpop.f32.mrb[12].mxu1 }
 0x462   :  { %v2298_v45 = vadd.f32 %v2290_v50, %v4300_v10  ;;  %v2284_v61 = vmul.f32 %v2276_v8, %v4309_v19  ;;  %v4320_v44 = vadd.f32 %v2263_v49, %v2166_v1  ;;  %v2265_v40 = vpop.f32.mrb[13].mxu1 }
 0x463   :  { %v2299_v3 = vadd.f32 %v2291_v32, %v4302_v30  ;;  %v2285_v63 = vmul.f32 %v2277_v39, %v4312_v29  ;;  %v4324_v34 = vadd.f32 %v2265_v40, %v2166_v1 }
 0x464   :  { %v2306_v15 = vmul.f32 0.7978846, %v2298_v45  ;;  %v2292_v24 = vmul.f32 0.044715, %v2284_v61  ;;  %v2278_v23 = vmul.f32 %v4320_v44, %v4320_v44 }
 0x465   :  { %v2307_v33 = vmul.f32 0.7978846, %v2299_v3  ;;  %v2293_v37 = vmul.f32 0.044715, %v2285_v63  ;;  %v2279_v60 = vmul.f32 %v4324_v34, %v4324_v34  ;;  %v2269_v31 = vpop.f32.mrb[14].mxu1 }
 0x466   :  { %2926 = vtanh.f32 %v2306_v15  ;;  %v2300_v27 = vadd.f32 %v2292_v24, %v4309_v19  ;;  %v2286_v52 = vmul.f32 %v2278_v23, %v4320_v44  ;;  %v4332_v17 = vadd.f32 %v2269_v31, %v2171_v41  ;;  %v2271_v36 = vpop.f32.mrb[15].mxu1 }
 0x467   :  { %2928 = vtanh.f32 %v2307_v33  ;;  %v2301_v62 = vadd.f32 %v2293_v37, %v4312_v29  ;;  %v2287_v54 = vmul.f32 %v2279_v60, %v4324_v34  ;;  %v4336_v56 = vadd.f32 %v2271_v36, %v2171_v41 }
 0x468   :  { %v2308_v53 = vmul.f32 0.7978846, %v2300_v27  ;;  %v2294_v16 = vmul.f32 0.044715, %v2286_v52  ;;  %v2280_v20 = vmul.f32 %v4332_v17, %v4332_v17 }
 0x469   :  { %v2309_v35 = vmul.f32 0.7978846, %v2301_v62  ;;  %v2295_v6 = vmul.f32 0.044715, %v2287_v54  ;;  %v2281_v51 = vmul.f32 %v4336_v56, %v4336_v56 }
 0x46a   :  { %2930 = vtanh.f32 %v2308_v53  ;;  %v2302_v38 = vadd.f32 %v2294_v16, %v4320_v44  ;;  %v2288_v22 = vmul.f32 %v2280_v20, %v4332_v17 }
 0x46b   :  { %2932 = vtanh.f32 %v2309_v35  ;;  %v2303_v11 = vadd.f32 %v2295_v6, %v4324_v34  ;;  %v2289_v46 = vmul.f32 %v2281_v51, %v4336_v56 }
 0x46c   :  { %v2310_v2 = vmul.f32 0.7978846, %v2302_v38  ;;  %v2296_v25 = vmul.f32 0.044715, %v2288_v22 }
 0x46d   :  { %v2311_v57 = vmul.f32 0.7978846, %v2303_v11  ;;  %v2297_v47 = vmul.f32 0.044715, %v2289_v46  ;;  %v2372_v46 = vpop.permute.xlu1 %2371 }
 0x46e   :  { %2934 = vtanh.f32 %v2310_v2  ;;  %v2304_v13 = vadd.f32 %v2296_v25, %v4332_v17 }
 0x46f   :  { %2936 = vtanh.f32 %v2311_v57  ;;  %v2305_v42 = vadd.f32 %v2297_v47, %v4336_v56 }
 0x470   :  { %v2927_v4 = vpop.eup %2926  ;;  %v2312_v26 = vmul.f32 0.7978846, %v2304_v13 }
 0x471   :  { %v2929_v21 = vpop.eup %2928  ;;  %v2322_v12 = vadd.f32 1.0, %v2927_v4  ;;  %v2313_v43 = vmul.f32 0.7978846, %v2305_v42 }
 0x472   :  { %2938 = vtanh.f32 %v2312_v26  ;;  %v2323_v48 = vadd.f32 1.0, %v2929_v21 }
 0x473   :  { %2940 = vtanh.f32 %v2313_v43  ;;  %v2330_v1 = vmul.f32 0.5, %v2322_v12 }
 0x474   :  { %v2931_v55 = vpop.eup %2930  ;;  %v2331_v50 = vmul.f32 0.5, %v2323_v48 }
 0x475   :  { %v2933_v8 = vpop.eup %2932  ;;  %v2324_v32 = vadd.f32 1.0, %v2931_v55  ;;  %v2338_v63 = vmul.f32 %v2330_v1, %v4300_v10 }
 0x476   :  { %v2325_v39 = vadd.f32 1.0, %v2933_v8  ;;  %v2339_v40 = vmul.f32 %v2331_v50, %v4302_v30 }
 0x477   :  { %v2332_v49 = vmul.f32 0.5, %v2324_v32 }
 0x478   :  { %v2935_v45 = vpop.eup %2934  ;;  %v2333_v61 = vmul.f32 0.5, %v2325_v39  ;;  %v4356_v60 = vadd.f32 %v2339_v40, %v4248_v18 }
 0x479   :  { %v2937_v3 = vpop.eup %2936  ;;  %v2340_v15 = vmul.f32 %v2332_v49, %v4309_v19  ;;  %v2326_v24 = vadd.f32 1.0, %v2935_v45  ;;  %v4362_v19 = vadd.f32 %v2338_v63, %v4254_v7 }
 0x47a   :  { %v2341_v23 = vmul.f32 %v2333_v61, %v4312_v29  ;;  %v2327_v41 = vadd.f32 1.0, %v2937_v3  ;;  %v2382_v3 = vpop.permute.xlu1 %2381 }
 0x47b   :  { %v4353_v33 = vadd.f32 %v2340_v15, %v4245_v58  ;;  %v2334_v52 = vmul.f32 0.5, %v2326_v24 }
 0x47c   :  { %v2939_v37 = vpop.eup %2938  ;;  %v4359_v31 = vadd.f32 %v2341_v23, %v4251_v59  ;;  %v2335_v30 = vmul.f32 0.5, %v2327_v41 }
 0x47d   :  { %v2941_v27 = vpop.eup %2940  ;;  %v2328_v10 = vadd.f32 1.0, %v2939_v37  ;;  %v2805_v62 = vpack.c.bf16 %v4353_v33, %v4362_v19  ;;  %v2342_v54 = vmul.f32 %v2334_v52, %v4320_v44 }
 0x47e   :  { %v2803_v29 = vpack.c.bf16 %v4359_v31, %v4356_v60  ;;  %v2329_v36 = vadd.f32 1.0, %v2941_v27  ;;  %v2343_v59 = vmul.f32 %v2335_v30, %v4324_v34 }
 0x47f   :  { %v2336_v58 = vmul.f32 0.5, %v2328_v10  ;;  %v4382_v6 = vadd.f32 %v2342_v54, %v4274_v0  ;;  %v2760_v0 = vld [vmem:[%s4491_s4 + $0x58] sm:$0xff] }
 0x480   :  { %2804 = vmatprep.subr.bf16.mxu0 %v2803_v29  ;;  %v2337_v18 = vmul.f32 0.5, %v2329_v36  ;;  %v4376_v20 = vadd.f32 %v2343_v59, %v4268_v28  ;;  %v2758_v28 = vld [vmem:[%s4491_s4 + $0x48] sm:$0xff] }
 0x481   :  { %v2344_v53 = vmul.f32 %v2336_v58, %v4332_v17  ;;  %2806 = vmatpush1.bf16.msra.mxu0 %v2805_v62  ;;  %v2367_v17 = vpop.permute.xlu0 %2366 }
 0x482   :  { %v2345_v7 = vmul.f32 %v2337_v18, %v4336_v56 }
 0x483   :  { %v4373_v16 = vadd.f32 %v2344_v53, %v4265_v5  ;;  %v2757_v5 = vld [vmem:[%s4491_s4 + $0x40] sm:$0xff] }
 0x484   :  { %v4379_v35 = vadd.f32 %v2345_v7, %v4271_v14  ;;  %v2759_v14 = vld [vmem:[%s4491_s4 + $0x50] sm:$0xff] }
 0x485   :  { %v2809_v34 = vpack.c.bf16 %v4373_v16, %v4382_v6  ;;  %v2377_v21 = vpop.permute.xlu0 %2376 }
 0x486   :  { %v2807_v44 = vpack.c.bf16 %v4379_v35, %v4376_v20 }
 0x488   :  { %2808 = vmatprep.subr.bf16.mxu0 %v2807_v44 }
 0x489   :  { %2810 = vmatpush1.bf16.msra.mxu0 %v2809_v34 }
 0x48c   :  { %2765 = vmatmul.mubr.msk.f32.vlgmr.msra.gmra.mrb[8].mxu0 %vm1961_vm10, %v2757_v5 }
 0x48d   :  { %2466 = vmatprep.mubr.f32.mxu0 %v2989_v9 }
 0x490   :  { %2766 = vmatmul.mubr.msk.f32.gmra.mrb[10].mxu0 %vm1961_vm10, %v2758_v28 }
 0x491   :  { %2472 = vmatprep.mubr.f32.mxu0 %v2989_v9 }
 0x494   :  { %2767 = vmatmul.mubr.msk.f32.gmra.mrb[12].mxu0 %vm1961_vm10, %v2759_v14 }
 0x495   :  { %2478 = vmatprep.mubr.f32.mxu0 %v2989_v9 }
 0x498   :  { %2768 = vmatmul.mubr.msk.f32.gmra.mrb[14].mxu0 %vm1961_vm10, %v2760_v0 }
 0x55f   :  { %v2462_v56 = vpop.f32.mrb[8].mxu0 }
 0x560   :  { %v4407_v51 = vadd.f32 %v2462_v56, %v2367_v17  ;;  %v2464_v38 = vpop.f32.mrb[9].mxu0 }
 0x561   :  { %v4409_v22 = vadd.f32 %v2464_v38, %v2367_v17 }
 0x562   :  { %v2485_v11 = vmul.f32 %v4407_v51, %v4407_v51 }
 0x563   :  { %v2486_v9 = vmul.f32 %v4409_v22, %v4409_v22  ;;  %v2468_v2 = vpop.f32.mrb[10].mxu0 }
 0x564   :  { %v2493_v25 = vmul.f32 %v2485_v11, %v4407_v51  ;;  %v4416_v57 = vadd.f32 %v2468_v2, %v2372_v46  ;;  %v2470_v47 = vpop.f32.mrb[11].mxu0 }
 0x565   :  { %v2494_v13 = vmul.f32 %v2486_v9, %v4409_v22  ;;  %v4419_v42 = vadd.f32 %v2470_v47, %v2372_v46 }
 0x566   :  { %v2501_v4 = vmul.f32 0.044715, %v2493_v25  ;;  %v2487_v26 = vmul.f32 %v4416_v57, %v4416_v57 }
 0x567   :  { %v2502_v12 = vmul.f32 0.044715, %v2494_v13  ;;  %v2488_v43 = vmul.f32 %v4419_v42, %v4419_v42  ;;  %v2474_v48 = vpop.f32.mrb[12].mxu0 }
 0x568   :  { %v2509_v55 = vadd.f32 %v2501_v4, %v4407_v51  ;;  %v2495_v50 = vmul.f32 %v2487_v26, %v4416_v57  ;;  %v4427_v8 = vadd.f32 %v2474_v48, %v2377_v21  ;;  %v2476_v1 = vpop.f32.mrb[13].mxu0 }
 0x569   :  { %v2510_v32 = vadd.f32 %v2502_v12, %v4409_v22  ;;  %v2496_v39 = vmul.f32 %v2488_v43, %v4419_v42  ;;  %v4431_v49 = vadd.f32 %v2476_v1, %v2377_v21 }
 0x56a   :  { %v2517_v45 = vmul.f32 0.7978846, %v2509_v55  ;;  %v2503_v61 = vmul.f32 0.044715, %v2495_v50  ;;  %v2489_v40 = vmul.f32 %v4427_v8, %v4427_v8 }
 0x56b   :  { %v2518_v63 = vmul.f32 0.7978846, %v2510_v32  ;;  %v2504_v15 = vmul.f32 0.044715, %v2496_v39  ;;  %v2490_v24 = vmul.f32 %v4431_v49, %v4431_v49  ;;  %v2480_v23 = vpop.f32.mrb[14].mxu0 }
 0x56c   :  { %2942 = vtanh.f32 %v2517_v45  ;;  %v2511_v41 = vadd.f32 %v2503_v61, %v4416_v57  ;;  %v2497_v37 = vmul.f32 %v2489_v40, %v4427_v8  ;;  %v4439_v30 = vadd.f32 %v2480_v23, %v2382_v3  ;;  %v2482_v27 = vpop.f32.mrb[15].mxu0 }
 0x56d   :  { %2944 = vtanh.f32 %v2518_v63  ;;  %v2512_v52 = vadd.f32 %v2504_v15, %v4419_v42  ;;  %v2498_v10 = vmul.f32 %v2490_v24, %v4431_v49  ;;  %v4443_v29 = vadd.f32 %v2482_v27, %v2382_v3 }
 0x56e   :  { %v2519_v36 = vmul.f32 0.7978846, %v2511_v41  ;;  %v2505_v58 = vmul.f32 0.044715, %v2497_v37  ;;  %v2491_v62 = vmul.f32 %v4439_v30, %v4439_v30 }
 0x56f   :  { %v2520_v18 = vmul.f32 0.7978846, %v2512_v52  ;;  %v2506_v59 = vmul.f32 0.044715, %v2498_v10  ;;  %v2492_v54 = vmul.f32 %v4443_v29, %v4443_v29 }
 0x570   :  { %2946 = vtanh.f32 %v2519_v36  ;;  %v2513_v53 = vadd.f32 %v2505_v58, %v4427_v8  ;;  %v2499_v7 = vmul.f32 %v2491_v62, %v4439_v30 }
 0x571   :  { %2948 = vtanh.f32 %v2520_v18  ;;  %v2514_v44 = vadd.f32 %v2506_v59, %v4431_v49  ;;  %v2500_v34 = vmul.f32 %v2492_v54, %v4443_v29 }
 0x572   :  { %v2521_v5 = vmul.f32 0.7978846, %v2513_v53  ;;  %v2507_v28 = vmul.f32 0.044715, %v2499_v7 }
 0x573   :  { %v2522_v14 = vmul.f32 0.7978846, %v2514_v44  ;;  %v2508_v0 = vmul.f32 0.044715, %v2500_v34 }
 0x574   :  { %2950 = vtanh.f32 %v2521_v5  ;;  %v2515_v17 = vadd.f32 %v2507_v28, %v4439_v30 }
 0x575   :  { %2952 = vtanh.f32 %v2522_v14  ;;  %v2516_v56 = vadd.f32 %v2508_v0, %v4443_v29 }
 0x576   :  { %v2943_v38 = vpop.eup %2942  ;;  %v2523_v11 = vmul.f32 0.7978846, %v2515_v17 }
 0x577   :  { %v2945_v46 = vpop.eup %2944  ;;  %v2533_v9 = vadd.f32 1.0, %v2943_v38  ;;  %v2524_v2 = vmul.f32 0.7978846, %v2516_v56 }
 0x578   :  { %2954 = vtanh.f32 %v2523_v11  ;;  %v2534_v25 = vadd.f32 1.0, %v2945_v46 }
 0x579   :  { %v2541_v47 = vmul.f32 0.5, %v2533_v9  ;;  %2956 = vtanh.f32 %v2524_v2 }
 0x57a   :  { %v2947_v13 = vpop.eup %2946  ;;  %v2542_v4 = vmul.f32 0.5, %v2534_v25 }
 0x57b   :  { %v2949_v26 = vpop.eup %2948  ;;  %v2535_v21 = vadd.f32 1.0, %v2947_v13  ;;  %v2549_v43 = vmul.f32 %v2541_v47, %v4407_v51 }
 0x57c   :  { %v2536_v12 = vadd.f32 1.0, %v2949_v26  ;;  %v2550_v1 = vmul.f32 %v2542_v4, %v4409_v22 }
 0x57d   :  { %v2543_v48 = vmul.f32 0.5, %v2535_v21  ;;  %v2557_v63 = vadd.f32 %v2549_v43, %v4362_v19 }
 0x57e   :  { %v2951_v55 = vpop.eup %2950  ;;  %v2544_v50 = vmul.f32 0.5, %v2536_v12  ;;  %v2558_v51 = vadd.f32 %v2550_v1, %v4356_v60 }
 0x57f   :  { %v2953_v32 = vpop.eup %2952  ;;  %v2551_v39 = vmul.f32 %v2543_v48, %v4416_v57  ;;  %v2537_v45 = vadd.f32 1.0, %v2951_v55 }
 0x580   :  { %v2552_v61 = vmul.f32 %v2544_v50, %v4419_v42  ;;  %v2538_v40 = vadd.f32 1.0, %v2953_v32 }
 0x581   :  { %v2545_v3 = vmul.f32 0.5, %v2537_v45  ;;  %v2559_v15 = vadd.f32 %v2551_v39, %v4353_v33 }
 0x582   :  { %v2955_v24 = vpop.eup %2954  ;;  %v2560_v23 = vadd.f32 %v2552_v61, %v4359_v31  ;;  %v2546_v41 = vmul.f32 0.5, %v2538_v40 }
 0x583   :  { %v2957_v37 = vpop.eup %2956  ;;  %v2539_v22 = vadd.f32 1.0, %v2955_v24  ;;  %v2813_v27 = vpack.c.bf16 %v2559_v15, %v2557_v63  ;;  %v2553_v10 = vmul.f32 %v2545_v3, %v4427_v8 }
 0x584   :  { %v2811_v52 = vpack.c.bf16 %v2560_v23, %v2558_v51  ;;  %v2540_v57 = vadd.f32 1.0, %v2957_v37  ;;  %v2554_v19 = vmul.f32 %v2546_v41, %v4431_v49  ;;  %v2565_v49 = vld [vmem:[%s4493_s6] sm:$0x3] }
 0x585   :  { %v2547_v42 = vmul.f32 0.5, %v2539_v22  ;;  %v2561_v31 = vadd.f32 %v2553_v10, %v4382_v6 }
 0x586   :  { %2812 = vmatprep.subr.bf16.mxu1 %v2811_v52  ;;  %v2548_v36 = vmul.f32 0.5, %v2540_v57  ;;  %v2562_v62 = vadd.f32 %v2554_v19, %v4376_v20 }
 0x587   :  { %v2555_v33 = vmul.f32 %v2547_v42, %v4439_v30  ;;  %2814 = vmatpush1.bf16.msra.mxu1 %v2813_v27  ;;  %v2570_v30 = vpop.permute.xlu0 %2569 }
 0x588   :  { %v2556_v60 = vmul.f32 %v2548_v36, %v4443_v29 }
 0x589   :  { %v2563_v58 = vadd.f32 %v2555_v33, %v4373_v16 }
 0x58a   :  { %v2564_v18 = vadd.f32 %v2556_v60, %v4379_v35 }
 0x58b   :  { %v2817_v59 = vpack.c.bf16 %v2563_v58, %v2561_v31 }
 0x58c   :  { %v2815_v8 = vpack.c.bf16 %v2564_v18, %v2562_v62 }
 0x58e   :  { %2816 = vmatprep.subr.bf16.mxu1 %v2815_v8 }
 0x58f   :  { %2818 = vmatpush1.bf16.msra.mxu1 %v2817_v59 }
 0x592   :  { %2769 = vmatmul.mubr.msk.f32.vlgmr.msra.gmra.mrb[16].mxu1 %vm1961_vm10, %v2565_v49 }
 0x665   :  { %v2641_v29 = vpop.f32.mrb[16].mxu1 }
 0x666   :  { %v2642_v54 = vadd.f32 %v2641_v29, %v2570_v30  ;;  %v2643_v6 = vpop.f32.mrb[17].mxu1 }
 0x667   :  { %v2644_v16 = vadd.f32 %v2643_v6, %v2570_v30 }
 0x669   :  { %v2648_v20 = vcombine.low %v2642_v54, %v2644_v16 }
 0x66b   :  { %2770 = vst.sshfl [vmem:[#allocation2] sm:$0x33 pattern:$0x76325410] %v2648_v20 }
 0x66c   :  { %2969 = shalt.err (!%p2966_p4)
}
 0x66d   :  { %s2970_s27 = scalar_lea.hbm %s4495_s8, 64 }
 0x66e   :  { %p2971_p5 = scmp.ne.s32.totalorder %s4495_s8, %s2970_s27  ;;  %p2974_p6 = scmp.lt.u32.totalorder %s2970_s27, %s4495_s8 }
 0x670   :  { %p2976_p7 = pnand %p2974_p6, %p2971_p5 }
 0x672   :  { %2979 = shalt.err (!%p2976_p7)
}
 0x673   :  { %2667 = dma.vmem_to_hbm [thread:$0]  %s2665_s25, 64, %s4495_s8, [#allocation3]  }
 0x674   :  { %2980 = dma.done.wait [#allocation3], 64  }
 0x675   :  { %2981 = vsyncadd [#allocation3], 4294967232 }
 0x676   :  { %2671 = vsyncpa [#allocation3], 1 }

</bundles_post_ra>
